<compile_context>
chip_gen: v7x
topology: tpu7x:2x2x1
jax: 0.10.0
libtpu: 0.0.40
codegen_flags: <defaults>
</compile_context>

<pallas_src>
import functools

import numpy as np
import jax
import jax.numpy as jnp
from jax.experimental import pallas as pl
from jax.experimental.pallas import tpu as pltpu

BN_EPS = 1e-5
LEAKY_SLOPE = 0.01
MXU_WEIGHT_DTYPE = jnp.bfloat16   # conv / deconv / fc weight matrices fed to the MXU
LANE = 128


def _round_up(x, m):
    return (x + m - 1) // m * m


# ----------------------- constant / weight preparation -----------------------
# "mat" layout used inside the kernel:  Mat(X)[n*H + h, w*C + c] = X[n, c, h, w]

def _conv_rows(n, h_in, h_out, stride):
    """Stacked (3*n*h_out, n*h_in) row-selection matrices (kh-major)."""
    r = np.zeros((3, n * h_out, n * h_in), np.float32)
    for kh in range(3):
        for b in range(n):
            for ho in range(h_out):
                hi = stride * ho + kh - 1
                if 0 <= hi < h_in:
                    r[kh, b * h_out + ho, b * h_in + hi] = 1.0
    return r.reshape(3 * n * h_out, n * h_in)


def _deconv_rows(n, h_in, h_out):
    r = np.zeros((3, n * h_out, n * h_in), np.float32)
    for kh in range(3):
        for b in range(n):
            for hi in range(h_in):
                ho = 2 * hi - 1 + kh
                if 0 <= ho < h_out:
                    r[kh, b * h_out + ho, b * h_in + hi] = 1.0
    return r.reshape(3 * n * h_out, n * h_in)


def _conv_lanes(w_oihw, w_in, w_out, stride):
    """Lstack[kh*(Win*Cin) + wi*Cin + ci, wo*Cout + co] = W[co,ci,kh,kw] at wi=stride*wo+kw-1."""
    c_out, c_in = w_oihw.shape[0], w_oihw.shape[1]
    p = np.zeros((3, w_in, w_out), np.float32)
    for kw in range(3):
        for wo in range(w_out):
            wi = stride * wo + kw - 1
            if 0 <= wi < w_in:
                p[kw, wi, wo] = 1.0
    l = np.einsum("kio,cahk->hiaoc", p, w_oihw)
    return l.reshape(3 * w_in * c_in, w_out * c_out)


def _deconv_lanes(w_iohw, w_in, w_out):
    """Lstack[kh*(Win*Cin) + wi*Cin + ci, wo*Cout + co] = Wt[ci,co,kh,kw] at wo=2*wi-1+kw."""
    c_in, c_out = w_iohw.shape[0], w_iohw.shape[1]
    p = np.zeros((3, w_in, w_out), np.float32)
    for kw in range(3):
        for wi in range(w_in):
            wo = 2 * wi - 1 + kw
            if 0 <= wo < w_out:
                p[kw, wi, wo] = 1.0
    l = np.einsum("kio,achk->hiaoc", p, w_iohw)
    return l.reshape(3 * w_in * c_in, w_out * c_out)


def _bn_avg(rows, w_out, c):
    # rowsum(1, w_out*c) @ avg  ->  per-channel mean broadcast back to all lanes
    return np.tile(np.eye(c, dtype=np.float32), (w_out, w_out)) / float(rows * w_out)


def _lane_tile(v, w_out):
    return np.tile(np.asarray(v, np.float32), w_out).reshape(1, -1)


class _SlabPacker:
    """Packs many small 2-D constants into one (rows, width) slab of one dtype."""

    def __init__(self, dtype, row_align):
        self.dtype = dtype
        self.row_align = row_align
        self._items = []                       # (name, np f32 array)

    def add(self, name, arr):
        arr = np.asarray(jax.device_get(arr), np.float32)
        assert arr.ndim == 2
        self._items.append((name, arr))

    def finalize(self):
        width = _round_up(max(a.shape[1] for _, a in self._items), LANE)
        layout, pieces, row = {}, [], 0
        for name, arr in self._items:
            r, c = arr.shape
            rp = _round_up(max(r, 1), self.row_align)   # keep every block sublane-aligned
            block = np.zeros((rp, width), np.float32)
            block[:r, :c] = arr
            layout[name] = (row, r, c)
            pieces.append(block)
            row += rp
        slab = np.concatenate(pieces, axis=0)
        return layout, jnp.asarray(slab, dtype=self.dtype)


# --------------------------- parameter creation ------------------------------

def _winit(key, shape, scale=0.1):
    return scale * jax.random.normal(key, shape, dtype=jnp.float32)


def init_vae_params(key, input_c=3, latent_dim=8, hidden_dim=(8, 16), img_size=16):
    hidden_dim = list(hidden_dim)
    final_size = img_size // (2 ** len(hidden_dim))
    params = {"hidden_dim": hidden_dim, "final_size": final_size,
              "latent_dim": latent_dim, "img_size": img_size, "input_c": input_c}

    keys = iter(jax.random.split(key, 64))

    # encoder: Conv2d(k3,s2,p1)+BN+LeakyReLU chain
    enc, in_c = [], input_c
    for h in hidden_dim:
        enc.append(dict(w=_winit(next(keys), (h, in_c, 3, 3)),
                        b=_winit(next(keys), (h,), 0.05),   # cancels under BN
                        gamma=jnp.ones((h,), jnp.float32),
                        beta=jnp.zeros((h,), jnp.float32)))
        in_c = h
    params["encoder"] = enc

    flat = hidden_dim[-1] * final_size ** 2
    params["fc_mu"] = dict(w=_winit(next(keys), (latent_dim, flat)),
                           b=_winit(next(keys), (latent_dim,), 0.05))
    params["fc_var"] = dict(w=_winit(next(keys), (latent_dim, flat)),
                            b=_winit(next(keys), (latent_dim,), 0.05))
    params["dec_in"] = dict(w=_winit(next(keys), (flat, latent_dim)),
                            b=_winit(next(keys), (flat,), 0.05))

    # decoder: ConvTranspose2d(k3,s2,p1,op1)+BN+LeakyReLU over reversed dims
    hrev = list(reversed(hidden_dim))
    dec = []
    for i in range(len(hrev) - 1):
        dec.append(dict(w=_winit(next(keys), (hrev[i], hrev[i + 1], 3, 3)),
                        b=_winit(next(keys), (hrev[i + 1],), 0.05),
                        gamma=jnp.ones((hrev[i + 1],), jnp.float32),
                        beta=jnp.zeros((hrev[i + 1],), jnp.float32)))
    params["decoder"] = dec

    last = hrev[-1]
    params["dec_out"] = dict(
        ct_w=_winit(next(keys), (last, last, 3, 3)),
        ct_b=_winit(next(keys), (last,), 0.05),            # cancels under BN
        gamma=jnp.ones((last,), jnp.float32),
        beta=jnp.zeros((last,), jnp.float32),
        conv_w=_winit(next(keys), (3, last, 3, 3)),
        conv_b=_winit(next(keys), (3,), 0.05))
    return params


def prepare_params(params, batch):
    """One-time (off the hot path) folding of weights into two constant slabs."""
    hidden = params["hidden_dim"]
    img, latent, fs = params["img_size"], params["latent_dim"], params["final_size"]
    n = batch
    assert fs == img // (2 ** len(hidden))
    npy = lambda a: np.asarray(jax.device_get(a), np.float32)

    f32p = _SlabPacker(jnp.float32, 8)           # selection / BN / bias constants
    bf16p = _SlabPacker(MXU_WEIGHT_DTYPE, 16)    # MXU weight operands

    # ---- encoder conv+BN+LeakyReLU layers (conv bias cancels exactly under BN)
    enc_names, h_in = [], img
    for li, layer in enumerate(params["encoder"]):
        w = npy(layer["w"])
        c_out = w.shape[0]
        assert h_in % 2 == 0
        h_out = h_in // 2
        name = f"enc{li}"
        f32p.add(name + "_R", _conv_rows(n, h_in, h_out, 2))
        bf16p.add(name + "_L", _conv_lanes(w, h_in, h_out, 2))
        f32p.add(name + "_avg", _bn_avg(n * h_out, h_out, c_out))
        f32p.add(name + "_g", _lane_tile(npy(layer["gamma"]), h_out))
        f32p.add(name + "_b", _lane_tile(npy(layer["beta"]), h_out))
        enc_names.append(name)
        h_in = h_out
    assert h_in == fs

    # ---- fc_mu / fc_var fused (torch flatten order folded into the weights)
    ce = hidden[-1]
    nb_pad = 8                                   # pad batch rows so sub-blocks stay aligned
    fc_r = np.zeros((fs, nb_pad, n * fs), np.float32)
    for hh in range(fs):
        for b in range(n):
            fc_r[hh, b, b * fs + hh] = 1.0
    f32p.add("fc_r", fc_r.reshape(fs * nb_pad, n * fs))

    def fc_fold(w):
        # torch (latent, C*fs*fs) -> [hh*(fs*C) + ww*C + c, l]
        return npy(w).reshape(latent, ce, fs, fs).transpose(2, 3, 1, 0).reshape(fs * fs * ce, latent)

    bf16p.add("fc_w", np.concatenate([fc_fold(params["fc_mu"]["w"]),
                                      fc_fold(params["fc_var"]["w"])], axis=1))
    f32p.add("fc_b", np.concatenate([npy(params["fc_mu"]["b"]),
                                     npy(params["fc_var"]["b"])]).reshape(1, 2 * latent))

    # ---- decoder input Linear (+ implicit view to (N, C0, fs, fs))
    c0 = hidden[-1]
    w_dec = npy(params["dec_in"]["w"]).reshape(c0, fs, fs, latent)       # [c, hh, ww, l]
    w_dec = w_dec.transpose(3, 1, 2, 0).reshape(latent, fs * fs * c0)    # [l, hh*fsC + ww*C + c]
    b_dec = npy(params["dec_in"]["b"]).reshape(c0, fs, fs).transpose(1, 2, 0).reshape(1, fs * fs * c0)
    bf16p.add("dec_w", w_dec)
    f32p.add("dec_b", b_dec)
    sf = np.zeros((fs, n * fs, n), np.float32)                           # unflatten scatter
    for hh in range(fs):
        for b in range(n):
            sf[hh, b * fs + hh, b] = 1.0
    f32p.add("sf_r", sf.reshape(fs * n * fs, n))

    # ---- decoder deconv+BN+LeakyReLU layers (incl. the one in decoder_output_layer)
    ol = params["dec_out"]
    dec_specs = [(l["w"], l["gamma"], l["beta"]) for l in params["decoder"]]
    dec_specs.append((ol["ct_w"], ol["gamma"], ol["beta"]))
    dec_names, h_cur = [], fs
    for li, (w, g, beta) in enumerate(dec_specs):
        w = npy(w)
        c_out = w.shape[1]
        h_out = h_cur * 2
        name = f"dec{li}"
        f32p.add(name + "_R", _deconv_rows(n, h_cur, h_out))
        bf16p.add(name + "_L", _deconv_lanes(w, h_cur, h_out))
        f32p.add(name + "_avg", _bn_avg(n * h_out, h_out, c_out))
        f32p.add(name + "_g", _lane_tile(npy(g), h_out))
        f32p.add(name + "_b", _lane_tile(npy(beta), h_out))
        dec_names.append(name)
        h_cur = h_out

    # ---- final 3x3 stride-1 conv + bias + sigmoid
    f32p.add("fin_R", _conv_rows(n, h_cur, h_cur, 1))
    bf16p.add("fin_L", _conv_lanes(npy(ol["conv_w"]), h_cur, h_cur, 1))
    f32p.add("fin_b", _lane_tile(npy(ol["conv_b"]), h_cur))

    lay_f32, slab_f32 = f32p.finalize()
    lay_bf16, slab_bf16 = bf16p.finalize()
    meta = dict(enc=enc_names, dec=dec_names, fs=fs, batch=n, latent=latent,
                img=img, out_c=3, lay_f32=lay_f32, lay_bf16=lay_bf16)
    return meta, (slab_f32, slab_bf16)


# -------------------------------- the kernel ---------------------------------

def _make_kernel(meta):
    lay_f, lay_w = meta["lay_f32"], meta["lay_bf16"]
    enc_names, dec_names = meta["enc"], meta["dec"]
    fs, n, latent = meta["fs"], meta["batch"], meta["latent"]

    def kernel(x_ref, eps_ref, cf_ref, cw_ref, muvar_ref, out_ref):
        # ---- static (trace-time) constant carving from the two slabs ----
        def cf(name):
            off, r, c = lay_f[name]
            return cf_ref[off:off + r, 0:c]

        def cw(name):
            off, r, c = lay_w[name]
            return cw_ref[off:off + r, 0:c]

        def mmw(a, b):    # activation @ bf16 weight, f32 accumulation (MXU)
            return jnp.dot(a.astype(b.dtype), b, preferred_element_type=jnp.float32)

        def mmf(a, b):    # exact f32 selection / BN-average matmul
            return jnp.dot(a, b, preferred_element_type=jnp.float32)

        def conv_taps(x, rname, lname):
            """3x3 conv/deconv along H via row selection; kh folded into K → 1 weight matmul."""
            roff, rr, rc = lay_f[rname]
            nr = rr // 3
            taps = [mmf(cf_ref[roff + kh * nr: roff + (kh + 1) * nr, 0:rc], x)
                    for kh in range(3)]
            t = jnp.concatenate(taps, axis=1)                     # (rows, 3*Win*Cin)
            return mmw(t, cw(lname))

        def bn_lrelu(y, name):
            # BatchNorm2d training-mode batch statistics, two-pass (robust) variance.
            avg = cf(name + "_avg")
            mean = mmf(jnp.sum(y, axis=0, keepdims=True), avg)
            yc = y - mean
            var = mmf(jnp.sum(yc * yc, axis=0, keepdims=True), avg)
            inv = jax.lax.rsqrt(var + BN_EPS)
            y = yc * (inv * cf(name + "_g")) + cf(name + "_b")
            return jnp.maximum(y, LEAKY_SLOPE * y)                # LeakyReLU

        # ------------------------------ encode ------------------------------
        h = x_ref[...]
        for name in enc_names:
            h = bn_lrelu(conv_taps(h, name + "_R", name + "_L"), name)

        # torch.flatten folded into fc_r selections + lane concat; fc_mu/fc_var fused.
        fcoff, fcr, fcc = lay_f["fc_r"]
        blk = fcr // fs
        pieces = [mmf(cf_ref[fcoff + i * blk: fcoff + (i + 1) * blk, 0:fcc], h)
                  for i in range(fs)]
        t = jnp.concatenate(pieces, axis=1)                       # (blk, fs*fs*C)
        muvar = mmw(t, cw("fc_w"))[0:n, :] + cf("fc_b")           # (n, 2*latent)
        muvar_ref[...] = muvar

        # -------------------------- reparameterize ---------------------------
        mu = muvar[:, 0:latent]
        log_var = muvar[:, latent:2 * latent]
        z = eps_ref[...] * jnp.exp(0.5 * log_var) + mu

        # ------------------------------ decode ------------------------------
        dflat = mmw(z, cw("dec_w")) + cf("dec_b")                 # (n, fs*fs*C0)
        sfoff, sfr, sfc = lay_f["sf_r"]
        sblk = sfr // fs
        fsc = dflat.shape[1] // fs
        d = mmf(cf_ref[sfoff:sfoff + sblk, 0:sfc], dflat[:, 0:fsc])
        for i in range(1, fs):
            d = d + mmf(cf_ref[sfoff + i * sblk: sfoff + (i + 1) * sblk, 0:sfc],
                        dflat[:, i * fsc:(i + 1) * fsc])

        for name in dec_names:
            d = bn_lrelu(conv_taps(d, name + "_R", name + "_L"), name)

        y = conv_taps(d, "fin_R", "fin_L") + cf("fin_b")
        out_ref[...] = 0.5 * (jnp.tanh(0.5 * y) + 1.0)            # stable sigmoid

    return kernel


def make_vae_forward(meta):
    kernel = _make_kernel(meta)
    n, latent, img, oc = meta["batch"], meta["latent"], meta["img"], meta["out_c"]
    vmem = functools.partial(pl.BlockSpec, memory_space=pltpu.MemorySpace.VMEM)

    call = pl.pallas_call(
        kernel,
        out_shape=(jax.ShapeDtypeStruct((n, 2 * latent), jnp.float32),
                   jax.ShapeDtypeStruct((n * img, img * oc), jnp.float32)),
        in_specs=[vmem(), vmem(), vmem(), vmem()],
        out_specs=(vmem(), vmem()),
    )

    def forward(slabs, x_nchw, eps_key):
        slab_f32, slab_bf16 = slabs
        nb, c, hh, ww = x_nchw.shape
        x_mat = jnp.transpose(x_nchw, (0, 2, 3, 1)).reshape(nb * hh, ww * c)
        eps = jax.random.normal(eps_key, (nb, latent), dtype=jnp.float32)
        muvar, ymat = call(x_mat, eps, slab_f32, slab_bf16)
        mu, log_var = muvar[:, :latent], muvar[:, latent:]
        # celeb_T (Resize + CenterCrop to img_size) is identity at this size.
        # TODO(synk): antialiased Resize for mismatched input sizes is not implemented.
        recon = ymat.reshape(nb, img, img, oc).transpose(0, 3, 1, 2).reshape(nb, -1)
        recon = jnp.nan_to_num(recon)       # torch.nan_to_num (sigmoid is finite)
        return recon, mu, log_var

    return jax.jit(forward)


# ---------------------------------- main --------------------------------------

if __name__ == "__main__":
    BATCH, INPUT_C, IMG = 2, 3, 16
    LATENT = 8
    HIDDEN = (8, 16)

    root = jax.random.PRNGKey(0)
    k_params, k_x, k_eps = jax.random.split(root, 3)

    params = init_vae_params(k_params, input_c=INPUT_C, latent_dim=LATENT,
                             hidden_dim=HIDDEN, img_size=IMG)
    x = jax.random.normal(k_x, (BATCH, INPUT_C, IMG, IMG), dtype=jnp.float32)

    # One-time weight folding into two constant slabs, then the fused forward.
    meta, slabs = prepare_params(params, batch=BATCH)
    vae_forward = make_vae_forward(meta)

    recon, mu, log_var = vae_forward(slabs, x, k_eps)
    jax.block_until_ready((recon, mu, log_var))

    assert recon.shape == (BATCH, 3 * IMG * IMG)
    assert mu.shape == (BATCH, LATENT) and log_var.shape == (BATCH, LATENT)
    assert bool(jnp.all(jnp.isfinite(recon)))
    assert bool(jnp.all(jnp.isfinite(mu))) and bool(jnp.all(jnp.isfinite(log_var)))
    print("KERNEL_OK")
</pallas_src>

<mosaic_0001>
module attributes {stable_mosaic.version = 11 : i64} {
  func.func @kernel(%arg0: memref<32x48xf32, #tpu.memory_space<vmem>>, %arg1: memref<2x8xf32, #tpu.memory_space<vmem>>, %arg2: memref<784x256xf32, #tpu.memory_space<vmem>>, %arg3: memref<1376x256xbf16, #tpu.memory_space<vmem>>, %arg4: memref<2x16xf32, #tpu.memory_space<vmem>>, %arg5: memref<32x48xf32, #tpu.memory_space<vmem>>) attributes {dimension_semantics = [], scalar_prefetch = 0 : i64, scratch_operands = 0 : i64, tpu.core_type = #tpu.core_type<tc>} {
    %c0 = arith.constant 0 : index
    %c0_0 = arith.constant 0 : index
    %0 = vector.load %arg0[%c0, %c0_0] : memref<32x48xf32, #tpu.memory_space<vmem>>, vector<32x48xf32>
    %c0_1 = arith.constant 0 : index
    %c0_2 = arith.constant 0 : index
    %1 = vector.load %arg2[%c0_1, %c0_2] : memref<784x256xf32, #tpu.memory_space<vmem>>, vector<16x32xf32>
    %cst = arith.constant dense<0.000000e+00> : vector<16x48xf32>
    %2 = tpu.matmul %1, %0, %cst {dimension_numbers = #tpu.dot_dimension_numbers<[1], [0], [0], [1], [0, 0, 1, 1], [], []>} : vector<16x32xf32>, vector<32x48xf32>, vector<16x48xf32> -> vector<16x48xf32>
    %c16 = arith.constant 16 : index
    %c0_3 = arith.constant 0 : index
    %3 = vector.load %arg2[%c16, %c0_3] : memref<784x256xf32, #tpu.memory_space<vmem>>, vector<16x32xf32>
    %cst_4 = arith.constant dense<0.000000e+00> : vector<16x48xf32>
    %4 = tpu.matmul %3, %0, %cst_4 {dimension_numbers = #tpu.dot_dimension_numbers<[1], [0], [0], [1], [0, 0, 1, 1], [], []>} : vector<16x32xf32>, vector<32x48xf32>, vector<16x48xf32> -> vector<16x48xf32>
    %c32 = arith.constant 32 : index
    %c0_5 = arith.constant 0 : index
    %5 = vector.load %arg2[%c32, %c0_5] : memref<784x256xf32, #tpu.memory_space<vmem>>, vector<16x32xf32>
    %cst_6 = arith.constant dense<0.000000e+00> : vector<16x48xf32>
    %6 = tpu.matmul %5, %0, %cst_6 {dimension_numbers = #tpu.dot_dimension_numbers<[1], [0], [0], [1], [0, 0, 1, 1], [], []>} : vector<16x32xf32>, vector<32x48xf32>, vector<16x48xf32> -> vector<16x48xf32>
    %7 = tpu.concatenate %2, %4, %6 in 1 : vector<16x48xf32>, vector<16x48xf32>, vector<16x48xf32> -> vector<16x144xf32>
    %c0_7 = arith.constant 0 : index
    %c0_8 = arith.constant 0 : index
    %8 = vector.load %arg3[%c0_7, %c0_8] : memref<1376x256xbf16, #tpu.memory_space<vmem>>, vector<144x64xbf16>
    %9 = arith.truncf %7 : vector<16x144xf32> to vector<16x144xbf16>
    %cst_9 = arith.constant dense<0.000000e+00> : vector<16x64xf32>
    %10 = tpu.matmul %9, %8, %cst_9 {dimension_numbers = #tpu.dot_dimension_numbers<[1], [0], [0], [1], [0, 0, 1, 1], [], []>} : vector<16x144xbf16>, vector<144x64xbf16>, vector<16x64xf32> -> vector<16x64xf32>
    %c48 = arith.constant 48 : index
    %c0_10 = arith.constant 0 : index
    %11 = vector.load %arg2[%c48, %c0_10] : memref<784x256xf32, #tpu.memory_space<vmem>>, vector<64x64xf32>
    %cst_11 = arith.constant dense<0.000000e+00> : vector<64xf32>
    %12 = vector.multi_reduction <add>, %10, %cst_11 [0] : vector<16x64xf32> to vector<64xf32>
    %13 = vector.shape_cast %12 : vector<64xf32> to vector<1x64xf32>
    %cst_12 = arith.constant dense<0.000000e+00> : vector<1x64xf32>
    %14 = tpu.matmul %13, %11, %cst_12 {dimension_numbers = #tpu.dot_dimension_numbers<[1], [0], [0], [1], [0, 0, 1, 1], [], []>} : vector<1x64xf32>, vector<64x64xf32>, vector<1x64xf32> -> vector<1x64xf32>
    %15 = vector.broadcast %14 : vector<1x64xf32> to vector<16x64xf32>
    %16 = arith.subf %10, %15 : vector<16x64xf32>
    %17 = arith.mulf %16, %16 : vector<16x64xf32>
    %cst_13 = arith.constant dense<0.000000e+00> : vector<64xf32>
    %18 = vector.multi_reduction <add>, %17, %cst_13 [0] : vector<16x64xf32> to vector<64xf32>
    %19 = vector.shape_cast %18 : vector<64xf32> to vector<1x64xf32>
    %cst_14 = arith.constant dense<0.000000e+00> : vector<1x64xf32>
    %20 = tpu.matmul %19, %11, %cst_14 {dimension_numbers = #tpu.dot_dimension_numbers<[1], [0], [0], [1], [0, 0, 1, 1], [], []>} : vector<1x64xf32>, vector<64x64xf32>, vector<1x64xf32> -> vector<1x64xf32>
    %cst_15 = arith.constant 9.99999974E-6 : f32
    %21 = vector.broadcast %cst_15 : f32 to vector<1x64xf32>
    %22 = arith.addf %20, %21 : vector<1x64xf32>
    %23 = math.rsqrt %22 : vector<1x64xf32>
    %c112 = arith.constant 112 : index
    %c0_16 = arith.constant 0 : index
    %24 = vector.load %arg2[%c112, %c0_16] : memref<784x256xf32, #tpu.memory_space<vmem>>, vector<1x64xf32>
    %25 = arith.mulf %23, %24 : vector<1x64xf32>
    %26 = vector.broadcast %25 : vector<1x64xf32> to vector<16x64xf32>
    %27 = arith.mulf %16, %26 : vector<16x64xf32>
    %c120 = arith.constant 120 : index
    %c0_17 = arith.constant 0 : index
    %28 = vector.load %arg2[%c120, %c0_17] : memref<784x256xf32, #tpu.memory_space<vmem>>, vector<1x64xf32>
    %29 = vector.broadcast %28 : vector<1x64xf32> to vector<16x64xf32>
    %30 = arith.addf %27, %29 : vector<16x64xf32>
    %cst_18 = arith.constant 0.00999999977 : f32
    %31 = vector.broadcast %cst_18 : f32 to vector<16x64xf32>
    %32 = arith.mulf %31, %30 : vector<16x64xf32>
    %33 = arith.maximumf %30, %32 : vector<16x64xf32>
    %c128 = arith.constant 128 : index
    %c0_19 = arith.constant 0 : index
    %34 = vector.load %arg2[%c128, %c0_19] : memref<784x256xf32, #tpu.memory_space<vmem>>, vector<8x16xf32>
    %cst_20 = arith.constant dense<0.000000e+00> : vector<8x64xf32>
    %35 = tpu.matmul %34, %33, %cst_20 {dimension_numbers = #tpu.dot_dimension_numbers<[1], [0], [0], [1], [0, 0, 1, 1], [], []>} : vector<8x16xf32>, vector<16x64xf32>, vector<8x64xf32> -> vector<8x64xf32>
    %c136 = arith.constant 136 : index
    %c0_21 = arith.constant 0 : index
    %36 = vector.load %arg2[%c136, %c0_21] : memref<784x256xf32, #tpu.memory_space<vmem>>, vector<8x16xf32>
    %cst_22 = arith.constant dense<0.000000e+00> : vector<8x64xf32>
    %37 = tpu.matmul %36, %33, %cst_22 {dimension_numbers = #tpu.dot_dimension_numbers<[1], [0], [0], [1], [0, 0, 1, 1], [], []>} : vector<8x16xf32>, vector<16x64xf32>, vector<8x64xf32> -> vector<8x64xf32>
    %c144 = arith.constant 144 : index
    %c0_23 = arith.constant 0 : index
    %38 = vector.load %arg2[%c144, %c0_23] : memref<784x256xf32, #tpu.memory_space<vmem>>, vector<8x16xf32>
    %cst_24 = arith.constant dense<0.000000e+00> : vector<8x64xf32>
    %39 = tpu.matmul %38, %33, %cst_24 {dimension_numbers = #tpu.dot_dimension_numbers<[1], [0], [0], [1], [0, 0, 1, 1], [], []>} : vector<8x16xf32>, vector<16x64xf32>, vector<8x64xf32> -> vector<8x64xf32>
    %40 = tpu.concatenate %35, %37, %39 in 1 : vector<8x64xf32>, vector<8x64xf32>, vector<8x64xf32> -> vector<8x192xf32>
    %c144_25 = arith.constant 144 : index
    %c0_26 = arith.constant 0 : index
    %41 = vector.load %arg3[%c144_25, %c0_26] : memref<1376x256xbf16, #tpu.memory_space<vmem>>, vector<192x64xbf16>
    %42 = arith.truncf %40 : vector<8x192xf32> to vector<8x192xbf16>
    %cst_27 = arith.constant dense<0.000000e+00> : vector<8x64xf32>
    %43 = tpu.matmul %42, %41, %cst_27 {dimension_numbers = #tpu.dot_dimension_numbers<[1], [0], [0], [1], [0, 0, 1, 1], [], []>} : vector<8x192xbf16>, vector<192x64xbf16>, vector<8x64xf32> -> vector<8x64xf32>
    %c152 = arith.constant 152 : index
    %c0_28 = arith.constant 0 : index
    %44 = vector.load %arg2[%c152, %c0_28] : memref<784x256xf32, #tpu.memory_space<vmem>>, vector<64x64xf32>
    %cst_29 = arith.constant dense<0.000000e+00> : vector<64xf32>
    %45 = vector.multi_reduction <add>, %43, %cst_29 [0] : vector<8x64xf32> to vector<64xf32>
    %46 = vector.shape_cast %45 : vector<64xf32> to vector<1x64xf32>
    %cst_30 = arith.constant dense<0.000000e+00> : vector<1x64xf32>
    %47 = tpu.matmul %46, %44, %cst_30 {dimension_numbers = #tpu.dot_dimension_numbers<[1], [0], [0], [1], [0, 0, 1, 1], [], []>} : vector<1x64xf32>, vector<64x64xf32>, vector<1x64xf32> -> vector<1x64xf32>
    %48 = vector.broadcast %47 : vector<1x64xf32> to vector<8x64xf32>
    %49 = arith.subf %43, %48 : vector<8x64xf32>
    %50 = arith.mulf %49, %49 : vector<8x64xf32>
    %cst_31 = arith.constant dense<0.000000e+00> : vector<64xf32>
    %51 = vector.multi_reduction <add>, %50, %cst_31 [0] : vector<8x64xf32> to vector<64xf32>
    %52 = vector.shape_cast %51 : vector<64xf32> to vector<1x64xf32>
    %cst_32 = arith.constant dense<0.000000e+00> : vector<1x64xf32>
    %53 = tpu.matmul %52, %44, %cst_32 {dimension_numbers = #tpu.dot_dimension_numbers<[1], [0], [0], [1], [0, 0, 1, 1], [], []>} : vector<1x64xf32>, vector<64x64xf32>, vector<1x64xf32> -> vector<1x64xf32>
    %cst_33 = arith.constant 9.99999974E-6 : f32
    %54 = vector.broadcast %cst_33 : f32 to vector<1x64xf32>
    %55 = arith.addf %53, %54 : vector<1x64xf32>
    %56 = math.rsqrt %55 : vector<1x64xf32>
    %c216 = arith.constant 216 : index
    %c0_34 = arith.constant 0 : index
    %57 = vector.load %arg2[%c216, %c0_34] : memref<784x256xf32, #tpu.memory_space<vmem>>, vector<1x64xf32>
    %58 = arith.mulf %56, %57 : vector<1x64xf32>
    %59 = vector.broadcast %58 : vector<1x64xf32> to vector<8x64xf32>
    %60 = arith.mulf %49, %59 : vector<8x64xf32>
    %c224 = arith.constant 224 : index
    %c0_35 = arith.constant 0 : index
    %61 = vector.load %arg2[%c224, %c0_35] : memref<784x256xf32, #tpu.memory_space<vmem>>, vector<1x64xf32>
    %62 = vector.broadcast %61 : vector<1x64xf32> to vector<8x64xf32>
    %63 = arith.addf %60, %62 : vector<8x64xf32>
    %cst_36 = arith.constant 0.00999999977 : f32
    %64 = vector.broadcast %cst_36 : f32 to vector<8x64xf32>
    %65 = arith.mulf %64, %63 : vector<8x64xf32>
    %66 = arith.maximumf %63, %65 : vector<8x64xf32>
    %c232 = arith.constant 232 : index
    %c0_37 = arith.constant 0 : index
    %67 = vector.load %arg2[%c232, %c0_37] : memref<784x256xf32, #tpu.memory_space<vmem>>, vector<8x8xf32>
    %cst_38 = arith.constant dense<0.000000e+00> : vector<8x64xf32>
    %68 = tpu.matmul %67, %66, %cst_38 {dimension_numbers = #tpu.dot_dimension_numbers<[1], [0], [0], [1], [0, 0, 1, 1], [], []>} : vector<8x8xf32>, vector<8x64xf32>, vector<8x64xf32> -> vector<8x64xf32>
    %c240 = arith.constant 240 : index
    %c0_39 = arith.constant 0 : index
    %69 = vector.load %arg2[%c240, %c0_39] : memref<784x256xf32, #tpu.memory_space<vmem>>, vector<8x8xf32>
    %cst_40 = arith.constant dense<0.000000e+00> : vector<8x64xf32>
    %70 = tpu.matmul %69, %66, %cst_40 {dimension_numbers = #tpu.dot_dimension_numbers<[1], [0], [0], [1], [0, 0, 1, 1], [], []>} : vector<8x8xf32>, vector<8x64xf32>, vector<8x64xf32> -> vector<8x64xf32>
    %c248 = arith.constant 248 : index
    %c0_41 = arith.constant 0 : index
    %71 = vector.load %arg2[%c248, %c0_41] : memref<784x256xf32, #tpu.memory_space<vmem>>, vector<8x8xf32>
    %cst_42 = arith.constant dense<0.000000e+00> : vector<8x64xf32>
    %72 = tpu.matmul %71, %66, %cst_42 {dimension_numbers = #tpu.dot_dimension_numbers<[1], [0], [0], [1], [0, 0, 1, 1], [], []>} : vector<8x8xf32>, vector<8x64xf32>, vector<8x64xf32> -> vector<8x64xf32>
    %c256 = arith.constant 256 : index
    %c0_43 = arith.constant 0 : index
    %73 = vector.load %arg2[%c256, %c0_43] : memref<784x256xf32, #tpu.memory_space<vmem>>, vector<8x8xf32>
    %cst_44 = arith.constant dense<0.000000e+00> : vector<8x64xf32>
    %74 = tpu.matmul %73, %66, %cst_44 {dimension_numbers = #tpu.dot_dimension_numbers<[1], [0], [0], [1], [0, 0, 1, 1], [], []>} : vector<8x8xf32>, vector<8x64xf32>, vector<8x64xf32> -> vector<8x64xf32>
    %75 = tpu.concatenate %68, %70, %72, %74 in 1 : vector<8x64xf32>, vector<8x64xf32>, vector<8x64xf32>, vector<8x64xf32> -> vector<8x256xf32>
    %c336 = arith.constant 336 : index
    %c0_45 = arith.constant 0 : index
    %76 = vector.load %arg3[%c336, %c0_45] : memref<1376x256xbf16, #tpu.memory_space<vmem>>, vector<256x16xbf16>
    %77 = arith.truncf %75 : vector<8x256xf32> to vector<8x256xbf16>
    %cst_46 = arith.constant dense<0.000000e+00> : vector<8x16xf32>
    %78 = tpu.matmul %77, %76, %cst_46 {dimension_numbers = #tpu.dot_dimension_numbers<[1], [0], [0], [1], [0, 0, 1, 1], [], []>} : vector<8x256xbf16>, vector<256x16xbf16>, vector<8x16xf32> -> vector<8x16xf32>
    %79 = vector.extract_strided_slice %78 {offsets = [0, 0], sizes = [2, 16], strides = [1, 1]} : vector<8x16xf32> to vector<2x16xf32>
    %c264 = arith.constant 264 : index
    %c0_47 = arith.constant 0 : index
    %80 = vector.load %arg2[%c264, %c0_47] : memref<784x256xf32, #tpu.memory_space<vmem>>, vector<1x16xf32>
    %81 = vector.broadcast %80 : vector<1x16xf32> to vector<2x16xf32>
    %82 = arith.addf %79, %81 : vector<2x16xf32>
    %c0_48 = arith.constant 0 : index
    %c0_49 = arith.constant 0 : index
    %83 = vector.load %arg4[%c0_48, %c0_49] : memref<2x16xf32, #tpu.memory_space<vmem>>, vector<2x16xf32>
    tpu.vector_store %arg4[%c0_48, %c0_49], %82 {strides = array<i32>} : memref<2x16xf32, #tpu.memory_space<vmem>>, vector<2x16xf32>,
    %84 = vector.extract_strided_slice %82 {offsets = [0, 0], sizes = [2, 8], strides = [1, 1]} : vector<2x16xf32> to vector<2x8xf32>
    %85 = vector.extract_strided_slice %82 {offsets = [0, 8], sizes = [2, 8], strides = [1, 1]} : vector<2x16xf32> to vector<2x8xf32>
    %c0_50 = arith.constant 0 : index
    %c0_51 = arith.constant 0 : index
    %86 = vector.load %arg1[%c0_50, %c0_51] : memref<2x8xf32, #tpu.memory_space<vmem>>, vector<2x8xf32>
    %cst_52 = arith.constant 5.000000e-01 : f32
    %87 = vector.broadcast %cst_52 : f32 to vector<2x8xf32>
    %88 = arith.mulf %87, %85 : vector<2x8xf32>
    %89 = math.exp %88 : vector<2x8xf32>
    %90 = arith.mulf %86, %89 : vector<2x8xf32>
    %91 = arith.addf %90, %84 : vector<2x8xf32>
    %c592 = arith.constant 592 : index
    %c0_53 = arith.constant 0 : index
    %92 = vector.load %arg3[%c592, %c0_53] : memref<1376x256xbf16, #tpu.memory_space<vmem>>, vector<8x256xbf16>
    %93 = arith.truncf %91 : vector<2x8xf32> to vector<2x8xbf16>
    %cst_54 = arith.constant dense<0.000000e+00> : vector<2x256xf32>
    %94 = tpu.matmul %93, %92, %cst_54 {dimension_numbers = #tpu.dot_dimension_numbers<[1], [0], [0], [1], [0, 0, 1, 1], [], []>} : vector<2x8xbf16>, vector<8x256xbf16>, vector<2x256xf32> -> vector<2x256xf32>
    %c272 = arith.constant 272 : index
    %c0_55 = arith.constant 0 : index
    %95 = vector.load %arg2[%c272, %c0_55] : memref<784x256xf32, #tpu.memory_space<vmem>>, vector<1x256xf32>
    %96 = vector.broadcast %95 : vector<1x256xf32> to vector<2x256xf32>
    %97 = arith.addf %94, %96 : vector<2x256xf32>
    %c280 = arith.constant 280 : index
    %c0_56 = arith.constant 0 : index
    %98 = vector.load %arg2[%c280, %c0_56] : memref<784x256xf32, #tpu.memory_space<vmem>>, vector<8x2xf32>
    %99 = vector.extract_strided_slice %97 {offsets = [0, 0], sizes = [2, 64], strides = [1, 1]} : vector<2x256xf32> to vector<2x64xf32>
    %cst_57 = arith.constant dense<0.000000e+00> : vector<8x64xf32>
    %100 = tpu.matmul %98, %99, %cst_57 {dimension_numbers = #tpu.dot_dimension_numbers<[1], [0], [0], [1], [0, 0, 1, 1], [], []>} : vector<8x2xf32>, vector<2x64xf32>, vector<8x64xf32> -> vector<8x64xf32>
    %c288 = arith.constant 288 : index
    %c0_58 = arith.constant 0 : index
    %101 = vector.load %arg2[%c288, %c0_58] : memref<784x256xf32, #tpu.memory_space<vmem>>, vector<8x2xf32>
    %102 = vector.extract_strided_slice %97 {offsets = [0, 64], sizes = [2, 64], strides = [1, 1]} : vector<2x256xf32> to vector<2x64xf32>
    %cst_59 = arith.constant dense<0.000000e+00> : vector<8x64xf32>
    %103 = tpu.matmul %101, %102, %cst_59 {dimension_numbers = #tpu.dot_dimension_numbers<[1], [0], [0], [1], [0, 0, 1, 1], [], []>} : vector<8x2xf32>, vector<2x64xf32>, vector<8x64xf32> -> vector<8x64xf32>
    %104 = arith.addf %100, %103 : vector<8x64xf32>
    %c296 = arith.constant 296 : index
    %c0_60 = arith.constant 0 : index
    %105 = vector.load %arg2[%c296, %c0_60] : memref<784x256xf32, #tpu.memory_space<vmem>>, vector<8x2xf32>
    %106 = vector.extract_strided_slice %97 {offsets = [0, 128], sizes = [2, 64], strides = [1, 1]} : vector<2x256xf32> to vector<2x64xf32>
    %cst_61 = arith.constant dense<0.000000e+00> : vector<8x64xf32>
    %107 = tpu.matmul %105, %106, %cst_61 {dimension_numbers = #tpu.dot_dimension_numbers<[1], [0], [0], [1], [0, 0, 1, 1], [], []>} : vector<8x2xf32>, vector<2x64xf32>, vector<8x64xf32> -> vector<8x64xf32>
    %108 = arith.addf %104, %107 : vector<8x64xf32>
    %c304 = arith.constant 304 : index
    %c0_62 = arith.constant 0 : index
    %109 = vector.load %arg2[%c304, %c0_62] : memref<784x256xf32, #tpu.memory_space<vmem>>, vector<8x2xf32>
    %110 = vector.extract_strided_slice %97 {offsets = [0, 192], sizes = [2, 64], strides = [1, 1]} : vector<2x256xf32> to vector<2x64xf32>
    %cst_63 = arith.constant dense<0.000000e+00> : vector<8x64xf32>
    %111 = tpu.matmul %109, %110, %cst_63 {dimension_numbers = #tpu.dot_dimension_numbers<[1], [0], [0], [1], [0, 0, 1, 1], [], []>} : vector<8x2xf32>, vector<2x64xf32>, vector<8x64xf32> -> vector<8x64xf32>
    %112 = arith.addf %108, %111 : vector<8x64xf32>
    %c312 = arith.constant 312 : index
    %c0_64 = arith.constant 0 : index
    %113 = vector.load %arg2[%c312, %c0_64] : memref<784x256xf32, #tpu.memory_space<vmem>>, vector<16x8xf32>
    %cst_65 = arith.constant dense<0.000000e+00> : vector<16x64xf32>
    %114 = tpu.matmul %113, %112, %cst_65 {dimension_numbers = #tpu.dot_dimension_numbers<[1], [0], [0], [1], [0, 0, 1, 1], [], []>} : vector<16x8xf32>, vector<8x64xf32>, vector<16x64xf32> -> vector<16x64xf32>
    %c328 = arith.constant 328 : index
    %c0_66 = arith.constant 0 : index
    %115 = vector.load %arg2[%c328, %c0_66] : memref<784x256xf32, #tpu.memory_space<vmem>>, vector<16x8xf32>
    %cst_67 = arith.constant dense<0.000000e+00> : vector<16x64xf32>
    %116 = tpu.matmul %115, %112, %cst_67 {dimension_numbers = #tpu.dot_dimension_numbers<[1], [0], [0], [1], [0, 0, 1, 1], [], []>} : vector<16x8xf32>, vector<8x64xf32>, vector<16x64xf32> -> vector<16x64xf32>
    %c344 = arith.constant 344 : index
    %c0_68 = arith.constant 0 : index
    %117 = vector.load %arg2[%c344, %c0_68] : memref<784x256xf32, #tpu.memory_space<vmem>>, vector<16x8xf32>
    %cst_69 = arith.constant dense<0.000000e+00> : vector<16x64xf32>
    %118 = tpu.matmul %117, %112, %cst_69 {dimension_numbers = #tpu.dot_dimension_numbers<[1], [0], [0], [1], [0, 0, 1, 1], [], []>} : vector<16x8xf32>, vector<8x64xf32>, vector<16x64xf32> -> vector<16x64xf32>
    %119 = tpu.concatenate %114, %116, %118 in 1 : vector<16x64xf32>, vector<16x64xf32>, vector<16x64xf32> -> vector<16x192xf32>
    %c608 = arith.constant 608 : index
    %c0_70 = arith.constant 0 : index
    %120 = vector.load %arg3[%c608, %c0_70] : memref<1376x256xbf16, #tpu.memory_space<vmem>>, vector<192x64xbf16>
    %121 = arith.truncf %119 : vector<16x192xf32> to vector<16x192xbf16>
    %cst_71 = arith.constant dense<0.000000e+00> : vector<16x64xf32>
    %122 = tpu.matmul %121, %120, %cst_71 {dimension_numbers = #tpu.dot_dimension_numbers<[1], [0], [0], [1], [0, 0, 1, 1], [], []>} : vector<16x192xbf16>, vector<192x64xbf16>, vector<16x64xf32> -> vector<16x64xf32>
    %c360 = arith.constant 360 : index
    %c0_72 = arith.constant 0 : index
    %123 = vector.load %arg2[%c360, %c0_72] : memref<784x256xf32, #tpu.memory_space<vmem>>, vector<64x64xf32>
    %cst_73 = arith.constant dense<0.000000e+00> : vector<64xf32>
    %124 = vector.multi_reduction <add>, %122, %cst_73 [0] : vector<16x64xf32> to vector<64xf32>
    %125 = vector.shape_cast %124 : vector<64xf32> to vector<1x64xf32>
    %cst_74 = arith.constant dense<0.000000e+00> : vector<1x64xf32>
    %126 = tpu.matmul %125, %123, %cst_74 {dimension_numbers = #tpu.dot_dimension_numbers<[1], [0], [0], [1], [0, 0, 1, 1], [], []>} : vector<1x64xf32>, vector<64x64xf32>, vector<1x64xf32> -> vector<1x64xf32>
    %127 = vector.broadcast %126 : vector<1x64xf32> to vector<16x64xf32>
    %128 = arith.subf %122, %127 : vector<16x64xf32>
    %129 = arith.mulf %128, %128 : vector<16x64xf32>
    %cst_75 = arith.constant dense<0.000000e+00> : vector<64xf32>
    %130 = vector.multi_reduction <add>, %129, %cst_75 [0] : vector<16x64xf32> to vector<64xf32>
    %131 = vector.shape_cast %130 : vector<64xf32> to vector<1x64xf32>
    %cst_76 = arith.constant dense<0.000000e+00> : vector<1x64xf32>
    %132 = tpu.matmul %131, %123, %cst_76 {dimension_numbers = #tpu.dot_dimension_numbers<[1], [0], [0], [1], [0, 0, 1, 1], [], []>} : vector<1x64xf32>, vector<64x64xf32>, vector<1x64xf32> -> vector<1x64xf32>
    %cst_77 = arith.constant 9.99999974E-6 : f32
    %133 = vector.broadcast %cst_77 : f32 to vector<1x64xf32>
    %134 = arith.addf %132, %133 : vector<1x64xf32>
    %135 = math.rsqrt %134 : vector<1x64xf32>
    %c424 = arith.constant 424 : index
    %c0_78 = arith.constant 0 : index
    %136 = vector.load %arg2[%c424, %c0_78] : memref<784x256xf32, #tpu.memory_space<vmem>>, vector<1x64xf32>
    %137 = arith.mulf %135, %136 : vector<1x64xf32>
    %138 = vector.broadcast %137 : vector<1x64xf32> to vector<16x64xf32>
    %139 = arith.mulf %128, %138 : vector<16x64xf32>
    %c432 = arith.constant 432 : index
    %c0_79 = arith.constant 0 : index
    %140 = vector.load %arg2[%c432, %c0_79] : memref<784x256xf32, #tpu.memory_space<vmem>>, vector<1x64xf32>
    %141 = vector.broadcast %140 : vector<1x64xf32> to vector<16x64xf32>
    %142 = arith.addf %139, %141 : vector<16x64xf32>
    %cst_80 = arith.constant 0.00999999977 : f32
    %143 = vector.broadcast %cst_80 : f32 to vector<16x64xf32>
    %144 = arith.mulf %143, %142 : vector<16x64xf32>
    %145 = arith.maximumf %142, %144 : vector<16x64xf32>
    %c440 = arith.constant 440 : index
    %c0_81 = arith.constant 0 : index
    %146 = vector.load %arg2[%c440, %c0_81] : memref<784x256xf32, #tpu.memory_space<vmem>>, vector<32x16xf32>
    %cst_82 = arith.constant dense<0.000000e+00> : vector<32x64xf32>
    %147 = tpu.matmul %146, %145, %cst_82 {dimension_numbers = #tpu.dot_dimension_numbers<[1], [0], [0], [1], [0, 0, 1, 1], [], []>} : vector<32x16xf32>, vector<16x64xf32>, vector<32x64xf32> -> vector<32x64xf32>
    %c472 = arith.constant 472 : index
    %c0_83 = arith.constant 0 : index
    %148 = vector.load %arg2[%c472, %c0_83] : memref<784x256xf32, #tpu.memory_space<vmem>>, vector<32x16xf32>
    %cst_84 = arith.constant dense<0.000000e+00> : vector<32x64xf32>
    %149 = tpu.matmul %148, %145, %cst_84 {dimension_numbers = #tpu.dot_dimension_numbers<[1], [0], [0], [1], [0, 0, 1, 1], [], []>} : vector<32x16xf32>, vector<16x64xf32>, vector<32x64xf32> -> vector<32x64xf32>
    %c504 = arith.constant 504 : index
    %c0_85 = arith.constant 0 : index
    %150 = vector.load %arg2[%c504, %c0_85] : memref<784x256xf32, #tpu.memory_space<vmem>>, vector<32x16xf32>
    %cst_86 = arith.constant dense<0.000000e+00> : vector<32x64xf32>
    %151 = tpu.matmul %150, %145, %cst_86 {dimension_numbers = #tpu.dot_dimension_numbers<[1], [0], [0], [1], [0, 0, 1, 1], [], []>} : vector<32x16xf32>, vector<16x64xf32>, vector<32x64xf32> -> vector<32x64xf32>
    %152 = tpu.concatenate %147, %149, %151 in 1 : vector<32x64xf32>, vector<32x64xf32>, vector<32x64xf32> -> vector<32x192xf32>
    %c800 = arith.constant 800 : index
    %c0_87 = arith.constant 0 : index
    %153 = vector.load %arg3[%c800, %c0_87] : memref<1376x256xbf16, #tpu.memory_space<vmem>>, vector<192x128xbf16>
    %154 = arith.truncf %152 : vector<32x192xf32> to vector<32x192xbf16>
    %cst_88 = arith.constant dense<0.000000e+00> : vector<32x128xf32>
    %155 = tpu.matmul %154, %153, %cst_88 {dimension_numbers = #tpu.dot_dimension_numbers<[1], [0], [0], [1], [0, 0, 1, 1], [], []>} : vector<32x192xbf16>, vector<192x128xbf16>, vector<32x128xf32> -> vector<32x128xf32>
    %c536 = arith.constant 536 : index
    %c0_89 = arith.constant 0 : index
    %156 = vector.load %arg2[%c536, %c0_89] : memref<784x256xf32, #tpu.memory_space<vmem>>, vector<128x128xf32>
    %cst_90 = arith.constant dense<0.000000e+00> : vector<128xf32>
    %157 = vector.multi_reduction <add>, %155, %cst_90 [0] : vector<32x128xf32> to vector<128xf32>
    %158 = vector.shape_cast %157 : vector<128xf32> to vector<1x128xf32>
    %cst_91 = arith.constant dense<0.000000e+00> : vector<1x128xf32>
    %159 = tpu.matmul %158, %156, %cst_91 {dimension_numbers = #tpu.dot_dimension_numbers<[1], [0], [0], [1], [0, 0, 1, 1], [], []>} : vector<1x128xf32>, vector<128x128xf32>, vector<1x128xf32> -> vector<1x128xf32>
    %160 = vector.broadcast %159 : vector<1x128xf32> to vector<32x128xf32>
    %161 = arith.subf %155, %160 : vector<32x128xf32>
    %162 = arith.mulf %161, %161 : vector<32x128xf32>
    %cst_92 = arith.constant dense<0.000000e+00> : vector<128xf32>
    %163 = vector.multi_reduction <add>, %162, %cst_92 [0] : vector<32x128xf32> to vector<128xf32>
    %164 = vector.shape_cast %163 : vector<128xf32> to vector<1x128xf32>
    %cst_93 = arith.constant dense<0.000000e+00> : vector<1x128xf32>
    %165 = tpu.matmul %164, %156, %cst_93 {dimension_numbers = #tpu.dot_dimension_numbers<[1], [0], [0], [1], [0, 0, 1, 1], [], []>} : vector<1x128xf32>, vector<128x128xf32>, vector<1x128xf32> -> vector<1x128xf32>
    %cst_94 = arith.constant 9.99999974E-6 : f32
    %166 = vector.broadcast %cst_94 : f32 to vector<1x128xf32>
    %167 = arith.addf %165, %166 : vector<1x128xf32>
    %168 = math.rsqrt %167 : vector<1x128xf32>
    %c664 = arith.constant 664 : index
    %c0_95 = arith.constant 0 : index
    %169 = vector.load %arg2[%c664, %c0_95] : memref<784x256xf32, #tpu.memory_space<vmem>>, vector<1x128xf32>
    %170 = arith.mulf %168, %169 : vector<1x128xf32>
    %171 = vector.broadcast %170 : vector<1x128xf32> to vector<32x128xf32>
    %172 = arith.mulf %161, %171 : vector<32x128xf32>
    %c672 = arith.constant 672 : index
    %c0_96 = arith.constant 0 : index
    %173 = vector.load %arg2[%c672, %c0_96] : memref<784x256xf32, #tpu.memory_space<vmem>>, vector<1x128xf32>
    %174 = vector.broadcast %173 : vector<1x128xf32> to vector<32x128xf32>
    %175 = arith.addf %172, %174 : vector<32x128xf32>
    %cst_97 = arith.constant 0.00999999977 : f32
    %176 = vector.broadcast %cst_97 : f32 to vector<32x128xf32>
    %177 = arith.mulf %176, %175 : vector<32x128xf32>
    %178 = arith.maximumf %175, %177 : vector<32x128xf32>
    %c680 = arith.constant 680 : index
    %c0_98 = arith.constant 0 : index
    %179 = vector.load %arg2[%c680, %c0_98] : memref<784x256xf32, #tpu.memory_space<vmem>>, vector<32x32xf32>
    %cst_99 = arith.constant dense<0.000000e+00> : vector<32x128xf32>
    %180 = tpu.matmul %179, %178, %cst_99 {dimension_numbers = #tpu.dot_dimension_numbers<[1], [0], [0], [1], [0, 0, 1, 1], [], []>} : vector<32x32xf32>, vector<32x128xf32>, vector<32x128xf32> -> vector<32x128xf32>
    %c712 = arith.constant 712 : index
    %c0_100 = arith.constant 0 : index
    %181 = vector.load %arg2[%c712, %c0_100] : memref<784x256xf32, #tpu.memory_space<vmem>>, vector<32x32xf32>
    %cst_101 = arith.constant dense<0.000000e+00> : vector<32x128xf32>
    %182 = tpu.matmul %181, %178, %cst_101 {dimension_numbers = #tpu.dot_dimension_numbers<[1], [0], [0], [1], [0, 0, 1, 1], [], []>} : vector<32x32xf32>, vector<32x128xf32>, vector<32x128xf32> -> vector<32x128xf32>
    %c744 = arith.constant 744 : index
    %c0_102 = arith.constant 0 : index
    %183 = vector.load %arg2[%c744, %c0_102] : memref<784x256xf32, #tpu.memory_space<vmem>>, vector<32x32xf32>
    %cst_103 = arith.constant dense<0.000000e+00> : vector<32x128xf32>
    %184 = tpu.matmul %183, %178, %cst_103 {dimension_numbers = #tpu.dot_dimension_numbers<[1], [0], [0], [1], [0, 0, 1, 1], [], []>} : vector<32x32xf32>, vector<32x128xf32>, vector<32x128xf32> -> vector<32x128xf32>
    %185 = tpu.concatenate %180, %182, %184 in 1 : vector<32x128xf32>, vector<32x128xf32>, vector<32x128xf32> -> vector<32x384xf32>
    %c992 = arith.constant 992 : index
    %c0_104 = arith.constant 0 : index
    %186 = vector.load %arg3[%c992, %c0_104] : memref<1376x256xbf16, #tpu.memory_space<vmem>>, vector<384x48xbf16>
    %187 = arith.truncf %185 : vector<32x384xf32> to vector<32x384xbf16>
    %cst_105 = arith.constant dense<0.000000e+00> : vector<32x48xf32>
    %188 = tpu.matmul %187, %186, %cst_105 {dimension_numbers = #tpu.dot_dimension_numbers<[1], [0], [0], [1], [0, 0, 1, 1], [], []>} : vector<32x384xbf16>, vector<384x48xbf16>, vector<32x48xf32> -> vector<32x48xf32>
    %c776 = arith.constant 776 : index
    %c0_106 = arith.constant 0 : index
    %189 = vector.load %arg2[%c776, %c0_106] : memref<784x256xf32, #tpu.memory_space<vmem>>, vector<1x48xf32>
    %190 = vector.broadcast %189 : vector<1x48xf32> to vector<32x48xf32>
    %191 = arith.addf %188, %190 : vector<32x48xf32>
    %cst_107 = arith.constant 5.000000e-01 : f32
    %192 = vector.broadcast %cst_107 : f32 to vector<32x48xf32>
    %193 = arith.mulf %192, %191 : vector<32x48xf32>
    %194 = math.tanh %193 : vector<32x48xf32>
    %cst_108 = arith.constant 1.000000e+00 : f32
    %195 = vector.broadcast %cst_108 : f32 to vector<32x48xf32>
    %196 = arith.addf %194, %195 : vector<32x48xf32>
    %cst_109 = arith.constant 5.000000e-01 : f32
    %197 = vector.broadcast %cst_109 : f32 to vector<32x48xf32>
    %198 = arith.mulf %197, %196 : vector<32x48xf32>
    %c0_110 = arith.constant 0 : index
    %c0_111 = arith.constant 0 : index
    %199 = vector.load %arg5[%c0_110, %c0_111] : memref<32x48xf32, #tpu.memory_space<vmem>>, vector<32x48xf32>
    tpu.vector_store %arg5[%c0_110, %c0_111], %198 {strides = array<i32>} : memref<32x48xf32, #tpu.memory_space<vmem>>, vector<32x48xf32>,
    return
  }
}

</mosaic_0001>

<bundles_post_ra>
// kernel: forward.1
= control target key start
LH: loop header
LB: loop body
LE: loop exit
PB: predicated region body
PF: predicated region fallthrough
CT: control target
= control target key end

     0   :  { %11 = vsyncpa [#allocation3], 0  ;;  %s5506_s0 = inlined_call_operand.vmem [shape: f32[32,48], index: 0, kind: input, shape index: {}]   ;;  %s5507_s1 = inlined_call_operand.vmem [shape: f32[2,8], index: 1, kind: input, shape index: {}]   ;;  %s5508_s2 = inlined_call_operand.hbm [shape: f32[784,256], index: 2, kind: input, shape index: {}]   ;;  %s5509_s3 = inlined_call_operand.hbm [shape: bf16[1376,256], index: 3, kind: input, shape index: {}]   ;;  %s5510_s4 = inlined_call_operand.vmem [shape: f32[2,16], index: 4, kind: output, shape index: {0}]   ;;  %s5511_s5 = inlined_call_operand.vmem [shape: f32[32,48], index: 5, kind: output, shape index: {1}]  }
   0x1   :  { %12 = vsyncpa [#allocation5], 0  ;;  %s5155_s18 = smov [#allocation2]   ;;  %s5107_s22 = scalar_lea.hbm %s5508_s2, 25088 }
   0x2   :  { %s22_s19 = sshll.u32 %s5155_s18, 4  ;;  %p5108_p0 = scmp.ne.s32.totalorder %s5508_s2, %s5107_s22  ;;  %s23_s19 = int_to_ptr.vmem [resolvable:$true] %s22_s19 }
   0x3   :  { %p5111_p1 = scmp.lt.u32.totalorder %s5107_s22, %s5508_s2 }
   0x5   :  { %p5113_p2 = pnand %p5111_p1, %p5108_p0 }
   0x7   :  { %5116 = shalt.err (!%p5113_p2)
}
   0x8   :  { %s5117_s27 = scalar_lea.vmem %s23_s19, 25088  ;;  %p5122_p4 = scmp.lt.s32.totalorder %s23_s19, %s23_s19 }
   0x9   :  { %p5118_p3 = scmp.ne.s32.totalorder %s23_s19, %s5117_s27  ;;  %p5123_p5 = scmp.lt.s32.totalorder %s5117_s27, %s5117_s27 }
   0xb   :  { %p5124_p6 = por %p5123_p5, %p5122_p4 }
   0xd   :  { %p5125_p7 = pnand %p5124_p6, %p5118_p3 }
   0xf   :  { %5128 = shalt.err (!%p5125_p7)
}
  0x10   :  { %s5156_s28 = smov 256   ;;  %s5157_s29 = smov 16  }
  0x11   :  { %28 = dma.hbm_to_vmem [thread:$0]  %s5508_s2, 25088, %s23_s19, [#allocation3], %s5156_s28, %s5156_s28, %s5157_s29  }
  0x12   :  { %s5158_s7 = smov [#allocation4]   ;;  %s5129_s11 = scalar_lea.hbm %s5509_s3, 22016 }
  0x13   :  { %s34_s8 = sshll.u32 %s5158_s7, 4  ;;  %p5130_p8 = scmp.ne.s32.totalorder %s5509_s3, %s5129_s11  ;;  %s35_s8 = int_to_ptr.vmem [resolvable:$true] %s34_s8 }
  0x14   :  { %p5133_p9 = scmp.lt.u32.totalorder %s5129_s11, %s5509_s3 }
  0x16   :  { %p5135_p10 = pnand %p5133_p9, %p5130_p8 }
  0x18   :  { %5138 = shalt.err (!%p5135_p10)
}
  0x19   :  { %s5139_s16 = scalar_lea.vmem %s35_s8, 22016  ;;  %p5144_p12 = scmp.lt.s32.totalorder %s35_s8, %s35_s8 }
  0x1a   :  { %p5140_p11 = scmp.ne.s32.totalorder %s35_s8, %s5139_s16  ;;  %p5145_p13 = scmp.lt.s32.totalorder %s5139_s16, %s5139_s16 }
  0x1c   :  { %p5146_p0 = por %p5145_p13, %p5144_p12 }
  0x1e   :  { %p5147_p1 = pnand %p5146_p0, %p5140_p11 }
  0x20   :  { %5150 = shalt.err (!%p5147_p1)
}
  0x21   :  { %s5159_s2 = smov 128   ;;  %s5160_s17 = smov 8  }
  0x22   :  { %40 = dma.hbm_to_vmem [thread:$0]  %s5509_s3, 22016, %s35_s8, [#allocation5], %s5159_s2, %s5159_s2, %s5160_s17  }
  0x23   :  { %5151 = dma.done.wait [#allocation3], 25088  }
  0x24   :  { %5152 = vsyncadd [#allocation3], 4294942208 }
  0x25   :  { %5153 = dma.done.wait [#allocation5], 22016  }
  0x26   :  { %5154 = vsyncadd [#allocation5], 4294945280  ;;  %vm54_vm0 = vcmask 261120   ;;  %v48_v0 = vld [vmem:[%s5506_s0] sm:$0xff]  ;;  %v49_v1 = vld [vmem:[%s5506_s0 + $0x8] sm:$0xff]  ;;  %v5161_v13 = vmov 0  }
  0x27   :  { %v50_v2 = vld [vmem:[%s5506_s0 + $0x10] sm:$0xff]  ;;  %v4763_v3 = vpack.c.bf16 %v49_v1, %v48_v0  ;;  %v51_v4 = vld [vmem:[%s5506_s0 + $0x18] sm:$0xff]  ;;  %v52_v5 = vld [vmem:[#allocation2] sm:$0xff]  ;;  %s5162_s0 = smov 48   ;;  %s5163_s27 = smov 96   ;;  %vm318_vm1 = vcmask 392192  }
  0x28   :  { %v136_v6 = vld [vmem:[#allocation2 + $0x20] sm:$0xff]  ;;  %v4767_v7 = vpack.c.bf16 %v51_v4, %v50_v2  ;;  %4386 = vmatprep.mubr.msk.f32.mxu0 %vm54_vm0, %v52_v5  ;;  %v53_v8 = vld [vmem:[#allocation2 + $0x10] sm:$0xff]  ;;  %vm321_vm2 = vcmask 785408   ;;  %vm398_vm3 = vcmask 130048   ;;  %v5164_v45 = vmov 0.0|0.0   ;;  %s5167_s28 = smov 64  }
  0x29   :  { %4397 = vmatprep.mubr.msk.f32.mxu1 %vm54_vm0, %v136_v6  ;;  %4764 = vmatprep.subr.bf16.mxu0 %v4763_v3  ;;  %v137_v9 = vld [vmem:[#allocation2 + $0x30] sm:$0xff]  ;;  %v219_v10 = vld [vmem:[#allocation2 + $0x40] sm:$0xff]  ;;  %vm5165_vm4 = vmmov 0   ;;  %v5166_v55 = vmov 0.0   ;;  %vm451_vm5 = vcmask 523264   ;;  %v534_v5 = vlaneseq  ;;  %s5168_s6 = smov 120  }
  0x2a   :  { %4772 = vmatprep.subr.bf16.mxu1 %v4763_v3  ;;  %4766 = vmatpush3.bf16.msra.mxu0 %v4763_v3  ;;  %v220_v11 = vld [vmem:[#allocation2 + $0x50] sm:$0xff]  ;;  %v5002_v12 = vld [vmem:[#allocation4] ss:$8 sps:$4 sm:$0xff]   ;;  %vm1195_vm6 = vcmask 64512   ;;  %vm1673_vm7 = vcmask 123904   ;;  %vm1708_vm8 = vcmask 1043456  }
  0x2b   :  { %4774 = vmatpush3.bf16.msra.mxu1 %v4763_v3  ;;  %4768 = vmatprep.subr.bf16.mxu0 %v4767_v7  ;;  %v5003_v14 = vld [vmem:[#allocation4 + $0x10] ss:$8 sps:$4 sm:$0xff]   ;;  %v5004_v15 = vld [vmem:[#allocation4 + $0x20] ss:$8 sps:$4 sm:$0xff]   ;;  %v5272_v6 = vshrl.u32 %v534_v5, 7  ;;  %vm1765_vm9 = vcmask 1041408  }
  0x2c   :  { %4776 = vmatprep.subr.bf16.mxu1 %v4767_v7  ;;  %v5005_v16 = vld [vmem:[#allocation4 + $0x30] ss:$8 sps:$4 sm:$0xff]   ;;  %v5006_v17 = vld [vmem:[#allocation4 + $0x40] ss:$8 sps:$4 sm:$0xff]   ;;  %vm1761_vm10 = vcmask 15360  }
  0x2d   :  { %v5007_v18 = vld [vmem:[#allocation4 + $0x50] ss:$8 sps:$4 sm:$0xff]   ;;  %v5008_v19 = vld [vmem:[#allocation4 + $0x60] ss:$8 sps:$4 sm:$0xff]  }
  0x2e   :  { %4770 = vmatpush3.bf16.msra.mxu0 %v4767_v7  ;;  %v5009_v20 = vld [vmem:[#allocation4 + $0x70] ss:$8 sps:$4 sm:$0xff]   ;;  %v5010_v21 = vld [vmem:[#allocation4 + $0x80] ss:$8 sps:$4 sm:$0xff]  }
  0x2f   :  { %4778 = vmatpush3.bf16.msra.mxu1 %v4767_v7  ;;  %4780 = vmatprep.subr.bf16.mxu0 %v4763_v3  ;;  %v443_v42 = vld [vmem:[#allocation2 + $0x60] sm:$0xff]  ;;  %v444_v43 = vld [vmem:[#allocation2 + $0x70] sm:$0xff] }
  0x30   :  { %402 = vmatprep.subr.bf16.mxu1 %v5161_v13  ;;  %v4788_v44 = vpack.c.bf16 %v444_v43, %v443_v42  ;;  %v445_v46 = vld [vmem:[#allocation2 + $0x80] sm:$0xff]  ;;  %v446_v47 = vld [vmem:[#allocation2 + $0x90] sm:$0xff] }
  0x31   :  { %4387 = vmatmul.mubr.msk.f32.vlgmr.msra.gmra.mrb[0].mxu0 %vm54_vm0, %v53_v8  ;;  %v4791_v48 = vpack.c.bf16 %v446_v47, %v445_v46  ;;  %v447_v49 = vld [vmem:[#allocation2 + $0xa0] sm:$0xff]  ;;  %v448_v50 = vld [vmem:[#allocation2 + $0xb0] sm:$0xff] }
  0x32   :  { %4398 = vmatmul.mubr.msk.f32.vlgmr.msra.gmra.mrb[0].mxu1 %vm54_vm0, %v137_v9  ;;  %4782 = vmatpush3.bf16.msra.mxu0 %v4763_v3  ;;  %v4794_v51 = vpack.c.bf16 %v448_v50, %v447_v49  ;;  %v449_v52 = vld [vmem:[#allocation2 + $0xc0] sm:$0xff]  ;;  %v450_v53 = vld [vmem:[#allocation2 + $0xd0] sm:$0xff] }
  0x33   :  { %4408 = vmatprep.mubr.msk.f32.mxu0 %vm54_vm0, %v219_v10  ;;  %4784 = vmatprep.subr.bf16.mxu0 %v4767_v7  ;;  %v4797_v54 = vpack.c.bf16 %v450_v53, %v449_v52  ;;  %v714_v42 = vld [vmem:[#allocation2 + $0x110] sm:$0xff]  ;;  %v640_v43 = vld [vmem:[#allocation2 + $0x100] sm:$0xff] }
  0x34   :  { %403 = vmatpush1.bf16.msra.mxu1 %v5002_v12  ;;  %v5011_v46 = vld [vmem:[#allocation4 + $0x90] ss:$8 sps:$4 sm:$0xff]   ;;  %v5012_v47 = vld [vmem:[#allocation4 + $0xa0] ss:$8 sps:$4 sm:$0xff]  }
  0x35   :  { %404 = vmatprep.subr.bf16.mxu1 %v5161_v13  ;;  %v5014_v49 = vld [vmem:[#allocation4 + $0xc0] ss:$8 sps:$4 sm:$0xff]   ;;  %v5015_v50 = vld [vmem:[#allocation4 + $0xd0] ss:$8 sps:$4 sm:$0xff]  }
  0x36   :  { %4786 = vmatpush3.bf16.msra.mxu0 %v4767_v7  ;;  %v5275_v7 = vsub.s32 0, %v5272_v6  ;;  %v5017_v52 = vld [vmem:[#allocation4 + $0xf0] ss:$8 sps:$4 sm:$0xff]   ;;  %v5018_v53 = vld [vmem:[#allocation4 + $0x100] ss:$8 sps:$4 sm:$0xff]  }
  0x37   :  { %4787 = vmatprep.subr.bf16.mxu0 %v5164_v45 }
  0x38   :  { %405 = vmatpush1.bf16.msra.mxu1 %v5003_v14 }
  0x39   :  { %4409 = vmatmul.mubr.msk.f32.vlgmr.msra.gmra.mrb[2].mxu0 %vm54_vm0, %v220_v11  ;;  %406 = vmatprep.subr.bf16.mxu1 %v5161_v13 }
  0x3a   :  { %4789 = vmatpush3.bf16.msra.mxu0 %v4788_v44  ;;  %4427 = vmatprep.mubr.msk.f32.mxu0 %vm5165_vm4, %v5166_v55 }
  0x3b   :  { %4790 = vmatprep.subr.bf16.mxu0 %v5164_v45 }
  0x3c   :  { %407 = vmatpush1.bf16.msra.mxu1 %v5004_v15 }
  0x3d   :  { %408 = vmatprep.subr.bf16.mxu1 %v5161_v13 }
  0x3e   :  { %4792 = vmatpush3.bf16.msra.mxu0 %v4791_v48 }
  0x3f   :  { %4793 = vmatprep.subr.bf16.mxu0 %v5164_v45 }
  0x40   :  { %409 = vmatpush1.bf16.msra.mxu1 %v5005_v16 }
  0x41   :  { %410 = vmatprep.subr.bf16.mxu1 %v5161_v13 }
  0x42   :  { %4795 = vmatpush3.bf16.msra.mxu0 %v4794_v51 }
  0x43   :  { %4796 = vmatprep.subr.bf16.mxu0 %v5164_v45 }
  0x44   :  { %411 = vmatpush1.bf16.msra.mxu1 %v5006_v17 }
  0x45   :  { %412 = vmatprep.subr.bf16.mxu1 %v5161_v13 }
  0x46   :  { %4798 = vmatpush3.bf16.msra.mxu0 %v4797_v54 }
  0x47   :  { %4799 = vmatprep.subr.bf16.mxu0 %v5164_v45 }
  0x48   :  { %413 = vmatpush1.bf16.msra.mxu1 %v5007_v18 }
  0x49   :  { %414 = vmatprep.subr.bf16.mxu1 %v5161_v13 }
  0x4c   :  { %415 = vmatpush1.bf16.msra.mxu1 %v5008_v19 }
  0x4d   :  { %416 = vmatprep.subr.bf16.mxu1 %v5161_v13 }
  0x50   :  { %417 = vmatpush1.bf16.msra.mxu1 %v5009_v20 }
  0x51   :  { %418 = vmatprep.subr.bf16.mxu1 %v5161_v13 }
  0x54   :  { %419 = vmatpush1.bf16.msra.mxu1 %v5010_v21 }
  0x55   :  { %4814 = vmatprep.subr.bf16.mxu1 %v5164_v45 }
 0x104   :  { %v4388_v22 = vpop.f32.mrb[0].mxu0 }
 0x105   :  { %v4399_v23 = vpop.f32.mrb[0].mxu1  ;;  %v127_v24 = vpop.f32.mrb[1].mxu0 }
 0x106   :  { %v210_v25 = vpop.f32.mrb[1].mxu1 }
 0x107   :  { %v4972_v26 = vpack.i.bf16 %v4399_v23, %v210_v25 }
 0x109   :  { %4973 = vrot.lane.b32.xlu0 %v4972_v26, %s5162_s0 }
 0x10c   :  { %v4410_v27 = vpop.f32.mrb[2].mxu0 }
 0x10d   :  { %v293_v28 = vpop.f32.mrb[3].mxu0 }
 0x10e   :  { %v4977_v29 = vpack.i.bf16 %v4410_v27, %v293_v28  ;;  %v625_v28 = vld [vmem:[#allocation2 + $0xe0] ss:$0 sm:$0xff] }
 0x110   :  { %4978 = vrot.lane.b32.xlu0 %v4977_v29, %s5163_s27 }
 0x17b   :  { %v4974_v30 = vpop.permute.xlu0 %4973 }
 0x17c   :  { %v4976_v31 = vunpack.i.h.bf16 %v4974_v30  ;;  %v4975_v32 = vunpack.i.l.bf16 %v4974_v30 }
 0x17e   :  { %v319_v36 = vsel %vm318_vm1, %v127_v24, %v4975_v32  ;;  %v320_v37 = vsel %vm318_vm1, %v4388_v22, %v4976_v31  ;;  %v633_v32 = vld [vmem:[#allocation2 + $0xf0] ss:$0 sm:$0xff] }
 0x182   :  { %v4979_v33 = vpop.permute.xlu0 %4978 }
 0x183   :  { %v4981_v34 = vunpack.i.h.bf16 %v4979_v33  ;;  %v4980_v35 = vunpack.i.l.bf16 %v4979_v33 }
 0x185   :  { %v323_v38 = vsel %vm321_vm2, %v320_v37, %v4981_v34  ;;  %v322_v39 = vsel %vm321_vm2, %v319_v36, %v4980_v35  ;;  %v343_v40 = vpack.c.bf16 %v4981_v34, %v4980_v35 }
 0x186   :  { %v342_v41 = vpack.c.bf16 %v323_v38, %v322_v39 }
 0x187   :  { %4000 = vmatprep.mubr.msk.bf16.mxu1 %vm398_vm3, %v343_v40 }
 0x188   :  { %435 = vmatmul.mubr.bf16.vlgmr.msra.gmra.mrb[4].mxu1 %v342_v41 }
 0x189   :  { %4460 = vmatprep.mubr.msk.f32.mxu1 %vm5165_vm4, %v5166_v55 }
 0x25b   :  { %v436_v56 = vpop.f32.mrb[4].mxu1 }
 0x25c   :  { %v438_v57 = vpop.f32.mrb[5].mxu1  ;;  %v452_v59 = vsel %vm451_vm5, %v436_v56, 0.0 }
 0x25d   :  { %v439_v58 = vpop.f32.mrb[6].mxu1  ;;  %v5021_v57 = vld [vmem:[#allocation4 + $0x130] ss:$8 sps:$4 sm:$0xff]  }
 0x25e   :  { %v453_v60 = vsel %vm451_vm5, %v439_v58, 0.0  ;;  %v441_v61 = vpop.f32.mrb[7].mxu1 }
 0x25f   :  { %v454_v62 = vadd.f32 %v453_v60, %v452_v59  ;;  %v1008_v59 = vld [vmem:[#allocation2 + $0x130] sm:$0xff]  ;;  %v1009_v60 = vld [vmem:[#allocation2 + $0x140] sm:$0xff] }
 0x260   :  { %v4821_v61 = vpack.c.bf16 %v1009_v60, %v1008_v59  ;;  %v1343_v59 = vld [vmem:[#allocation2 + $0x1f0] sm:$0xff]  ;;  %v1417_v60 = vld [vmem:[#allocation2 + $0x200] sm:$0xff] }
 0x261   :  { %v455_v63 = vrot.slane %v454_v62, 4 }
 0x263   :  { %v456_v0 = vadd.f32 %v455_v63, %v454_v62 }
 0x265   :  { %v457_v1 = vrot.slane %v456_v0, 2 }
 0x267   :  { %v458_v2 = vadd.f32 %v457_v1, %v456_v0 }
 0x269   :  { %v459_v3 = vrot.slane %v458_v2, 1 }
 0x26b   :  { %v460_v4 = vadd.f32 %v459_v3, %v458_v2 }
 0x26d   :  { %4428 = vmatmul.mubr.msk.f32.vlgmr.msra.gmra.mrb[4].mxu0 %vm451_vm5, %v460_v4 }
 0x26e   :  { %4801 = vmatpush3.bf16.msra.mxu0 %v4788_v44  ;;  %4446 = vmatprep.mubr.msk.f32.mxu0 %vm5165_vm4, %v5166_v55  ;;  %v788_v44 = vld [vmem:[#allocation2 + $0x120] sm:$0xff] }
 0x26f   :  { %4802 = vmatprep.subr.bf16.mxu0 %v5164_v45 }
 0x272   :  { %4804 = vmatpush3.bf16.msra.mxu0 %v4791_v48  ;;  %v5013_v48 = vld [vmem:[#allocation4 + $0xb0] ss:$8 sps:$4 sm:$0xff]  }
 0x273   :  { %4805 = vmatprep.subr.bf16.mxu0 %v5164_v45 }
 0x276   :  { %4807 = vmatpush3.bf16.msra.mxu0 %v4794_v51  ;;  %v5016_v51 = vld [vmem:[#allocation4 + $0xe0] ss:$8 sps:$4 sm:$0xff]  }
 0x277   :  { %4808 = vmatprep.subr.bf16.mxu0 %v5164_v45 }
 0x27a   :  { %4810 = vmatpush3.bf16.msra.mxu0 %v4797_v54  ;;  %v5019_v54 = vld [vmem:[#allocation4 + $0x110] ss:$8 sps:$4 sm:$0xff]  }
 0x27b   :  { %4811 = vmatprep.subr.bf16.mxu0 %v5164_v45 }
 0x340   :  { %v530_v8 = vpop.f32.mrb[4].mxu0 }
 0x341   :  { %v537_v9 = vrot.slane %v530_v8, %v5275_v7  ;;  %v4429_v10 = vpop.f32.mrb[5].mxu0 }
 0x342   :  { %v1010_v10 = vld [vmem:[#allocation2 + $0x150] sm:$0xff] }
 0x343   :  { %v538_v11 = vsub.f32 %v436_v56, %v537_v9  ;;  %v539_v12 = vsub.f32 %v439_v58, %v537_v9  ;;  %v5020_v56 = vld [vmem:[#allocation4 + $0x120] ss:$8 sps:$4 sm:$0xff]  }
 0x344   :  { %v5022_v58 = vld [vmem:[#allocation4 + $0x140] ss:$8 sps:$4 sm:$0xff]  }
 0x345   :  { %v540_v14 = vmul.f32 %v538_v11, %v538_v11  ;;  %v541_v15 = vmul.f32 %v539_v12, %v539_v12 }
 0x347   :  { %v542_v16 = vsel %vm451_vm5, %v540_v14, 0.0  ;;  %v543_v17 = vsel %vm451_vm5, %v541_v15, 0.0  ;;  %v1012_v14 = vld [vmem:[#allocation2 + $0x170] sm:$0xff]  ;;  %v1013_v15 = vld [vmem:[#allocation2 + $0x180] sm:$0xff] }
 0x348   :  { %v544_v18 = vadd.f32 %v543_v17, %v542_v16  ;;  %v4827_v16 = vpack.c.bf16 %v1013_v15, %v1012_v14  ;;  %v1014_v17 = vld [vmem:[#allocation2 + $0x190] sm:$0xff] }
 0x34a   :  { %v545_v19 = vrot.slane %v544_v18, 4 }
 0x34c   :  { %v546_v20 = vadd.f32 %v545_v19, %v544_v18  ;;  %v1015_v18 = vld [vmem:[#allocation2 + $0x1a0] sm:$0xff] }
 0x34d   :  { %v4830_v19 = vpack.c.bf16 %v1015_v18, %v1014_v17  ;;  %v5038_v18 = vld [vmem:[#allocation4 + $0x1c0] ss:$8 sps:$4 sm:$0xff]  }
 0x34e   :  { %v547_v21 = vrot.slane %v546_v20, 2 }
 0x350   :  { %v548_v22 = vadd.f32 %v547_v21, %v546_v20 }
 0x352   :  { %v549_v23 = vrot.slane %v548_v22, 1 }
 0x354   :  { %v550_v24 = vadd.f32 %v549_v23, %v548_v22 }
 0x356   :  { %4447 = vmatmul.mubr.msk.f32.vlgmr.msra.gmra.mrb[6].mxu0 %vm451_vm5, %v550_v24 }
 0x357   :  { %4453 = vmatprep.mubr.msk.f32.mxu0 %vm5165_vm4, %v5166_v55 }
 0x429   :  { %v620_v25 = vpop.f32.mrb[6].mxu0 }
 0x42a   :  { %v621_v26 = vadd.f32 1e-05, %v620_v25  ;;  %v4448_v27 = vpop.f32.mrb[7].mxu0 }
 0x42c   :  { %5089 = vrsqrt.f32 %v621_v26 }
 0x436   :  { %v5090_v29 = vpop.eup %5089 }
 0x437   :  { %v626_v30 = vmul.f32 %v5090_v29, %v625_v28 }
 0x439   :  { %v630_v31 = vrot.slane %v626_v30, %v5275_v7 }
 0x43b   :  { %v631_v33 = vmul.f32 %v630_v31, %v538_v11  ;;  %v632_v34 = vmul.f32 %v630_v31, %v539_v12  ;;  %v1011_v11 = vld [vmem:[#allocation2 + $0x160] sm:$0xff] }
 0x43c   :  { %v4824_v12 = vpack.c.bf16 %v1011_v11, %v1010_v10  ;;  %v5034_v10 = vld [vmem:[#allocation4 + $0x1a0] ss:$8 sps:$4 sm:$0xff]   ;;  %v5035_v11 = vld [vmem:[#allocation4 + $0x230] ss:$8 sps:$4 sm:$0xff]  }
 0x43d   :  { %v634_v35 = vadd.f32 %v633_v32, %v631_v33  ;;  %v635_v36 = vadd.f32 %v633_v32, %v632_v34 }
 0x43f   :  { %v636_v37 = vmul.f32 0.01, %v634_v35  ;;  %v637_v38 = vmul.f32 0.01, %v635_v36 }
 0x441   :  { %v638_v39 = vmax.f32 %v634_v35, %v636_v37  ;;  %v639_v40 = vmax.f32 %v635_v36, %v637_v38 }
 0x443   :  { %v4812_v41 = vpack.c.bf16 %v639_v40, %v638_v39 }
 0x445   :  { %4813 = vmatpush3.bf16.msra.mxu0 %v4812_v41  ;;  %4816 = vmatpush3.bf16.msra.mxu1 %v4812_v41 }
 0x446   :  { %4817 = vmatprep.subr.bf16.mxu0 %v5164_v45  ;;  %968 = vmatprep.subr.bf16.mxu1 %v5161_v13 }
 0x448   :  { %4461 = vmatmul.mubr.msk.f32.vlgmr.msra.gmra.mrb[2].mxu1 %vm398_vm3, %v714_v42  ;;  %4454 = vmatmul.mubr.msk.f32.vlgmr.msra.gmra.mrb[8].mxu0 %vm398_vm3, %v640_v43 }
 0x449   :  { %4819 = vmatpush3.bf16.msra.mxu0 %v4812_v41  ;;  %4467 = vmatprep.mubr.msk.f32.mxu0 %vm5165_vm4, %v5166_v55 }
 0x44a   :  { %4820 = vmatprep.subr.bf16.mxu0 %v5164_v45  ;;  %969 = vmatpush1.bf16.msra.mxu1 %v5011_v46 }
 0x44b   :  { %970 = vmatprep.subr.bf16.mxu1 %v5161_v13 }
 0x44c   :  { %4468 = vmatmul.mubr.msk.f32.vlgmr.msra.gmra.mrb[10].mxu0 %vm398_vm3, %v788_v44 }
 0x44d   :  { %4486 = vmatprep.mubr.msk.f32.mxu0 %vm5165_vm4, %v5166_v55  ;;  %4822 = vmatpush3.bf16.msra.mxu0 %v4821_v61 }
 0x44e   :  { %971 = vmatpush1.bf16.msra.mxu1 %v5012_v47  ;;  %4823 = vmatprep.subr.bf16.mxu0 %v5164_v45  ;;  %v1183_v47 = vld [vmem:[#allocation2 + $0x1b0] ss:$0 sm:$0xff] }
 0x44f   :  { %972 = vmatprep.subr.bf16.mxu1 %v5161_v13 }
 0x451   :  { %4825 = vmatpush3.bf16.msra.mxu0 %v4824_v12 }
 0x452   :  { %973 = vmatpush1.bf16.msra.mxu1 %v5013_v48  ;;  %4826 = vmatprep.subr.bf16.mxu0 %v5164_v45 }
 0x453   :  { %974 = vmatprep.subr.bf16.mxu1 %v5161_v13 }
 0x455   :  { %4828 = vmatpush3.bf16.msra.mxu0 %v4827_v16 }
 0x456   :  { %975 = vmatpush1.bf16.msra.mxu1 %v5014_v49  ;;  %4829 = vmatprep.subr.bf16.mxu0 %v5164_v45 }
 0x457   :  { %976 = vmatprep.subr.bf16.mxu1 %v5161_v13 }
 0x459   :  { %4831 = vmatpush3.bf16.msra.mxu0 %v4830_v19 }
 0x45a   :  { %977 = vmatpush1.bf16.msra.mxu1 %v5015_v50  ;;  %4832 = vmatprep.subr.bf16.mxu0 %v5164_v45 }
 0x45b   :  { %978 = vmatprep.subr.bf16.mxu1 %v5161_v13 }
 0x45e   :  { %979 = vmatpush1.bf16.msra.mxu1 %v5016_v51  ;;  %v1190_v51 = vld [vmem:[#allocation2 + $0x1c0] ss:$0 sm:$0xff] }
 0x45f   :  { %980 = vmatprep.subr.bf16.mxu1 %v5161_v13 }
 0x462   :  { %981 = vmatpush1.bf16.msra.mxu1 %v5017_v52 }
 0x463   :  { %982 = vmatprep.subr.bf16.mxu1 %v5161_v13 }
 0x466   :  { %983 = vmatpush1.bf16.msra.mxu1 %v5018_v53 }
 0x467   :  { %984 = vmatprep.subr.bf16.mxu1 %v5161_v13 }
 0x46a   :  { %985 = vmatpush1.bf16.msra.mxu1 %v5019_v54 }
 0x46b   :  { %986 = vmatprep.subr.bf16.mxu1 %v5161_v13 }
 0x46e   :  { %987 = vmatpush1.bf16.msra.mxu1 %v5020_v56 }
 0x46f   :  { %988 = vmatprep.subr.bf16.mxu1 %v5161_v13 }
 0x472   :  { %989 = vmatpush1.bf16.msra.mxu1 %v5021_v57  ;;  %v1194_v57 = vld [vmem:[#allocation2 + $0x1d0] sm:$0xff] }
 0x473   :  { %990 = vmatprep.subr.bf16.mxu1 %v5161_v13 }
 0x476   :  { %991 = vmatpush1.bf16.msra.mxu1 %v5022_v58  ;;  %v1269_v58 = vld [vmem:[#allocation2 + $0x1e0] sm:$0xff] }
 0x51b   :  { %v784_v62 = vpop.f32.mrb[2].mxu1  ;;  %v710_v63 = vpop.f32.mrb[8].mxu0 }
 0x51c   :  { %863 = vrot.lane.b32.xlu1 %v784_v62, %s5167_s28  ;;  %v4462_v0 = vpop.f32.mrb[3].mxu1  ;;  %v4455_v1 = vpop.f32.mrb[9].mxu0  ;;  %v5024_v62 = vld [vmem:[#allocation4 + $0x150] ss:$8 sps:$4 sm:$0xff]  }
 0x51d   :  { %v5026_v0 = vld [vmem:[#allocation4 + $0x160] ss:$8 sps:$4 sm:$0xff]   ;;  %v5027_v1 = vld [vmem:[#allocation4 + $0x1f0] ss:$8 sps:$4 sm:$0xff]  }
 0x51f   :  { %v858_v2 = vpop.f32.mrb[10].mxu0 }
 0x520   :  { %v892_v3 = vpack.c.bf16 %v858_v2, %v858_v2  ;;  %v4469_v4 = vpop.f32.mrb[11].mxu0  ;;  %v5028_v2 = vld [vmem:[#allocation4 + $0x170] ss:$8 sps:$4 sm:$0xff]  }
 0x521   :  { %v5030_v4 = vld [vmem:[#allocation4 + $0x180] ss:$8 sps:$4 sm:$0xff]  }
 0x522   :  { %4018 = vmatprep.mubr.msk.bf16.mxu1 %vm451_vm5, %v892_v3  ;;  %v5029_v3 = vld [vmem:[#allocation4 + $0x200] ss:$8 sps:$4 sm:$0xff]  }
 0x58e   :  { %v864_v5 = vpop.permute.xlu1 %863 }
 0x58f   :  { %v866_v8 = vsel %vm451_vm5, %v710_v63, %v864_v5  ;;  %v5025_v63 = vld [vmem:[#allocation4 + $0x1e0] ss:$8 sps:$4 sm:$0xff]   ;;  %v5031_v5 = vld [vmem:[#allocation4 + $0x210] ss:$8 sps:$4 sm:$0xff]  }
 0x590   :  { %v891_v9 = vpack.c.bf16 %v866_v8, %v866_v8  ;;  %v5032_v8 = vld [vmem:[#allocation4 + $0x190] ss:$8 sps:$4 sm:$0xff]  }
 0x592   :  { %1001 = vmatmul.mubr.bf16.vlgmr.msra.gmra.mrb[8].mxu1 %v891_v9  ;;  %v5033_v9 = vld [vmem:[#allocation4 + $0x220] ss:$8 sps:$4 sm:$0xff]  }
 0x665   :  { %v1002_v20 = vpop.f32.mrb[8].mxu1 }
 0x666   :  { %v1016_v21 = vsel %vm451_vm5, %v1002_v20, 0.0  ;;  %v1004_v22 = vpop.f32.mrb[9].mxu1 }
 0x667   :  { %v1017_v23 = vrot.slane %v1016_v21, 4  ;;  %v1005_v24 = vpop.f32.mrb[10].mxu1 }
 0x668   :  { %v1006_v25 = vpop.f32.mrb[11].mxu1 }
 0x669   :  { %v1018_v26 = vadd.f32 %v1017_v23, %v1016_v21 }
 0x66b   :  { %v1019_v27 = vrot.slane %v1018_v26, 2 }
 0x66d   :  { %v1020_v28 = vadd.f32 %v1019_v27, %v1018_v26 }
 0x66f   :  { %v1021_v29 = vrot.slane %v1020_v28, 1 }
 0x671   :  { %v1022_v30 = vadd.f32 %v1021_v29, %v1020_v28 }
 0x673   :  { %4487 = vmatmul.mubr.msk.f32.vlgmr.msra.gmra.mrb[12].mxu0 %vm451_vm5, %v1022_v30 }
 0x674   :  { %4834 = vmatpush3.bf16.msra.mxu0 %v4821_v61  ;;  %4505 = vmatprep.mubr.msk.f32.mxu0 %vm5165_vm4, %v5166_v55  ;;  %v5023_v61 = vld [vmem:[#allocation4 + $0x1d0] ss:$8 sps:$4 sm:$0xff]  }
 0x675   :  { %4835 = vmatprep.subr.bf16.mxu0 %v5164_v45  ;;  %4207 = vmatprep.subr.bf16.mxu1 %v5023_v61 }
 0x676   :  { %4208 = vmatpush3.bf16.msra.mxu1 %v5024_v62 }
 0x677   :  { %4209 = vmatprep.subr.bf16.mxu1 %v5025_v63  ;;  %v1757_v63 = vld [vmem:[#allocation2 + $0x240] sm:$0xff] }
 0x678   :  { %4837 = vmatpush3.bf16.msra.mxu0 %v4824_v12  ;;  %v5036_v12 = vld [vmem:[#allocation4 + $0x1b0] ss:$8 sps:$4 sm:$0xff]  }
 0x679   :  { %4838 = vmatprep.subr.bf16.mxu0 %v5164_v45 }
 0x67a   :  { %4210 = vmatpush3.bf16.msra.mxu1 %v5026_v0 }
 0x67b   :  { %4211 = vmatprep.subr.bf16.mxu1 %v5027_v1  ;;  %v1913_v1 = vld [vmem:[#allocation2 + $0x250] sm:$0xff] }
 0x67c   :  { %4840 = vmatpush3.bf16.msra.mxu0 %v4827_v16  ;;  %v5037_v16 = vld [vmem:[#allocation4 + $0x240] ss:$8 sps:$4 sm:$0xff]  }
 0x67d   :  { %4841 = vmatprep.subr.bf16.mxu0 %v5164_v45 }
 0x67e   :  { %4212 = vmatpush3.bf16.msra.mxu1 %v5028_v2 }
 0x67f   :  { %4213 = vmatprep.subr.bf16.mxu1 %v5029_v3  ;;  %v1991_v3 = vld [vmem:[#allocation2 + $0x260] sm:$0xff] }
 0x680   :  { %4843 = vmatpush3.bf16.msra.mxu0 %v4830_v19 }
 0x681   :  { %4508 = vmatprep.subr.mxu0 %v5166_v55 }
 0x682   :  { %4214 = vmatpush3.bf16.msra.mxu1 %v5030_v4  ;;  %v2070_v4 = vld [vmem:[#allocation2 + $0x270] sm:$0xff] }
 0x683   :  { %4215 = vmatprep.subr.bf16.mxu1 %v5031_v5 }
 0x686   :  { %4216 = vmatpush3.bf16.msra.mxu1 %v5032_v8  ;;  %v2071_v8 = vld [vmem:[#allocation2 + $0x280] sm:$0xff] }
 0x687   :  { %4217 = vmatprep.subr.bf16.mxu1 %v5033_v9 }
 0x68a   :  { %4218 = vmatpush3.bf16.msra.mxu1 %v5034_v10  ;;  %v2153_v10 = vld [vmem:[#allocation2 + $0x290] sm:$0xff] }
 0x68b   :  { %4219 = vmatprep.subr.bf16.mxu1 %v5035_v11  ;;  %v2154_v11 = vld [vmem:[#allocation2 + $0x2a0] sm:$0xff] }
 0x68e   :  { %4220 = vmatpush3.bf16.msra.mxu1 %v5036_v12  ;;  %v2236_v12 = vld [vmem:[#allocation2 + $0x2b0] sm:$0xff] }
 0x68f   :  { %4221 = vmatprep.subr.bf16.mxu1 %v5037_v16  ;;  %v5042_v16 = vld [vmem:[#allocation4 + $0x270] ss:$8 sps:$4 sm:$0xff]  }
 0x692   :  { %4222 = vmatpush3.bf16.msra.mxu1 %v5038_v18  ;;  %v5044_v18 = vld [vmem:[#allocation4 + $0x290] ss:$8 sps:$4 sm:$0xff]  }
 0x693   :  { %2430 = vmatprep.subr.bf16.mxu1 %v5161_v13 }
 0x746   :  { %v1092_v31 = vpop.f32.mrb[12].mxu0 }
 0x747   :  { %v1099_v32 = vrot.slane %v1092_v31, %v5275_v7  ;;  %v4488_v33 = vpop.f32.mrb[13].mxu0 }
 0x749   :  { %v1100_v34 = vsub.f32 %v1002_v20, %v1099_v32 }
 0x74b   :  { %v1101_v35 = vmul.f32 %v1100_v34, %v1100_v34 }
 0x74d   :  { %v1102_v36 = vsel %vm451_vm5, %v1101_v35, 0.0 }
 0x74e   :  { %v1103_v37 = vrot.slane %v1102_v36, 4 }
 0x750   :  { %v1104_v38 = vadd.f32 %v1103_v37, %v1102_v36 }
 0x752   :  { %v1105_v39 = vrot.slane %v1104_v38, 2 }
 0x754   :  { %v1106_v40 = vadd.f32 %v1105_v39, %v1104_v38 }
 0x756   :  { %v1107_v41 = vrot.slane %v1106_v40, 1 }
 0x758   :  { %v1108_v42 = vadd.f32 %v1107_v41, %v1106_v40  ;;  %v1685_v41 = vld [vmem:[#allocation4 + $0x250] sm:$0xff] }
 0x75a   :  { %4506 = vmatmul.mubr.msk.f32.vlgmr.msra.gmra.mrb[14].mxu0 %vm451_vm5, %v1108_v42  ;;  %v4042_v42 = vcombine.high %v1685_v41, %v1685_v41 }
 0x75b   :  { %4510 = vmatprep.mubr.msk.f32.mxu0 %vm5165_vm4, %v5166_v55 }
 0x82d   :  { %v1178_v43 = vpop.f32.mrb[14].mxu0 }
 0x82e   :  { %v1179_v44 = vadd.f32 1e-05, %v1178_v43  ;;  %v4507_v46 = vpop.f32.mrb[15].mxu0  ;;  %v4041_v43 = vcombine.low %v1685_v41, %v1685_v41  ;;  %v2471_v41 = vld [vmem:[#allocation2 + $0x2d0] sm:$0xff] }
 0x830   :  { %5091 = vrsqrt.f32 %v1179_v44  ;;  %v1710_v44 = vsel %vm1708_vm8, %v4041_v43, 0 }
 0x83a   :  { %v5092_v48 = vpop.eup %5091 }
 0x83b   :  { %v1184_v49 = vmul.f32 %v5092_v48, %v1183_v47  ;;  %v1675_v47 = vld [vmem:[%s5507_s1] sm:$0x3] }
 0x83d   :  { %v1188_v50 = vrot.slane %v1184_v49, %v5275_v7 }
 0x83f   :  { %v1189_v52 = vmul.f32 %v1188_v50, %v1100_v34  ;;  %v1671_v34 = vld [vmem:[#allocation2 + $0x210] ss:$0 sm:$0xff] }
 0x841   :  { %v1191_v53 = vadd.f32 %v1190_v51, %v1189_v52  ;;  %v1688_v52 = vld [vmem:[#allocation2 + $0x220] ss:$8 sm:$0x3] }
 0x843   :  { %v1192_v54 = vmul.f32 0.01, %v1191_v53 }
 0x845   :  { %v1193_v56 = vmax.f32 %v1191_v53, %v1192_v54  ;;  %v1696_v53 = vsub.s32 1, %v5272_v6  ;;  %v1693_v54 = vrot.slane %v1688_v52, %v5275_v7  ;;  %v1756_v6 = vld [vmem:[#allocation2 + $0x230] sm:$0xff] }
 0x847   :  { %4509 = vmatpush3.msra.mxu0 %v1193_v56 }
 0x848   :  { %4511 = vmatmul.mubr.msk.f32.vlgmr.msra.gmra.mrb[16].mxu0 %vm1195_vm6, %v1194_v57  ;;  %4513 = vmatprep.subr.mxu0 %v5166_v55 }
 0x849   :  { %4514 = vmatpush3.msra.mxu0 %v1193_v56  ;;  %4515 = vmatprep.mubr.msk.f32.mxu0 %vm5165_vm4, %v5166_v55 }
 0x84a   :  { %4518 = vmatprep.subr.mxu0 %v5166_v55 }
 0x84c   :  { %4516 = vmatmul.mubr.msk.f32.vlgmr.msra.gmra.mrb[18].mxu0 %vm1195_vm6, %v1269_v58 }
 0x84d   :  { %4519 = vmatpush3.msra.mxu0 %v1193_v56  ;;  %4520 = vmatprep.mubr.msk.f32.mxu0 %vm5165_vm4, %v5166_v55 }
 0x84e   :  { %4523 = vmatprep.subr.mxu0 %v5166_v55 }
 0x850   :  { %4521 = vmatmul.mubr.msk.f32.vlgmr.msra.gmra.mrb[20].mxu0 %vm1195_vm6, %v1343_v59 }
 0x851   :  { %4524 = vmatpush3.msra.mxu0 %v1193_v56  ;;  %4525 = vmatprep.mubr.msk.f32.mxu0 %vm5165_vm4, %v5166_v55  ;;  %v1697_v56 = vrot.slane %v1688_v52, %v1696_v53  ;;  %v2478_v52 = vld [vmem:[#allocation2 + $0x340] sm:$0xff] }
 0x852   :  { %4043 = vmatprep.subr.msk.bf16.mxu0 %vm1708_vm8, %v4042_v42  ;;  %v2472_v42 = vld [vmem:[#allocation2 + $0x2e0] sm:$0xff] }
 0x853   :  { %v4845_v43 = vpack.c.bf16 %v2472_v42, %v2471_v41  ;;  %v2668_v41 = vld [vmem:[#allocation2 + $0x380] sm:$0xff] }
 0x854   :  { %4526 = vmatmul.mubr.msk.f32.vlgmr.msra.gmra.mrb[22].mxu0 %vm1195_vm6, %v1417_v60  ;;  %v2870_v42 = vld [vmem:[#allocation2 + $0x400] sm:$0xff] }
 0x855   :  { %1747 = vmatprep.mubr.bf16.mxu0 %v5161_v13  ;;  %1716 = vmatpush1.bf16.msra.mxu0 %v1710_v44  ;;  %v2473_v44 = vld [vmem:[#allocation2 + $0x2f0] sm:$0xff] }
 0x856   :  { %4528 = vmatprep.subr.mxu0 %v5166_v55 }
 0x91b   :  { %v1265_v14 = vpop.f32.mrb[16].mxu0 }
 0x91c   :  { %v4512_v15 = vpop.f32.mrb[17].mxu0 }
 0x91d   :  { %v5041_v15 = vld [vmem:[#allocation4 + $0x260] ss:$8 sps:$4 sm:$0xff]  }
 0x91f   :  { %v1339_v17 = vpop.f32.mrb[18].mxu0 }
 0x920   :  { %v4517_v19 = vpop.f32.mrb[19].mxu0 }
 0x921   :  { %v5045_v19 = vld [vmem:[#allocation4 + $0x2a0] ss:$8 sps:$4 sm:$0xff]  }
 0x923   :  { %v1413_v20 = vpop.f32.mrb[20].mxu0 }
 0x924   :  { %v4522_v21 = vpop.f32.mrb[21].mxu0 }
 0x925   :  { %v5047_v21 = vld [vmem:[#allocation4 + $0x2c0] ss:$8 sps:$4 sm:$0xff]  }
 0x927   :  { %v1487_v22 = vpop.f32.mrb[22].mxu0 }
 0x928   :  { %v4982_v23 = vpack.i.bf16 %v1339_v17, %v1487_v22  ;;  %v4527_v24 = vpop.f32.mrb[23].mxu0  ;;  %v5043_v17 = vld [vmem:[#allocation4 + $0x280] ss:$8 sps:$4 sm:$0xff]   ;;  %v5048_v22 = vld [vmem:[#allocation4 + $0x2d0] ss:$8 sps:$4 sm:$0xff]  }
 0x929   :  { %v5050_v24 = vld [vmem:[#allocation4 + $0x2f0] ss:$8 sps:$4 sm:$0xff]  }
 0x92a   :  { %4983 = vrot.lane.b32.xlu1 %v4982_v23, %s5167_s28  ;;  %v5049_v23 = vld [vmem:[#allocation4 + $0x2e0] ss:$8 sps:$4 sm:$0xff]  }
 0x99c   :  { %v4984_v25 = vpop.permute.xlu1 %4983 }
 0x99d   :  { %v4986_v26 = vunpack.i.h.bf16 %v4984_v25  ;;  %v4985_v27 = vunpack.i.l.bf16 %v4984_v25  ;;  %v5051_v25 = vld [vmem:[#allocation4 + $0x300] ss:$8 sps:$4 sm:$0xff]  }
 0x99f   :  { %v1499_v28 = vsel %vm451_vm5, %v1265_v14, %v4986_v26  ;;  %v1500_v29 = vsel %vm451_vm5, %v1413_v20, %v4985_v27  ;;  %v2237_v14 = vld [vmem:[#allocation2 + $0x2c0] sm:$0xff]  ;;  %v5046_v20 = vld [vmem:[#allocation4 + $0x2b0] ss:$8 sps:$4 sm:$0xff]  }
 0x9a0   :  { %v1533_v30 = vpack.c.bf16 %v1499_v28, %v1499_v28  ;;  %v1534_v31 = vpack.c.bf16 %v1500_v29, %v1500_v29  ;;  %v5052_v26 = vld [vmem:[#allocation4 + $0x310] ss:$8 sps:$4 sm:$0xff]  }
 0x9a2   :  { %1663 = vmatprep.mubr.bf16.mxu1 %v1534_v31 }
 0x9a3   :  { %1664 = vmatmul.mubr.bf16.vlgmr.msra.gmra.mrb[12].mxu1 %v1533_v30 }
 0x9a4   :  { %2431 = vmatpush1.bf16.msra.mxu1 %v5041_v15 }
 0x9a5   :  { %2432 = vmatprep.subr.bf16.mxu1 %v5161_v13 }
 0x9a8   :  { %2433 = vmatpush1.bf16.msra.mxu1 %v5042_v16 }
 0x9a9   :  { %2434 = vmatprep.subr.bf16.mxu1 %v5161_v13 }
 0x9ac   :  { %2435 = vmatpush1.bf16.msra.mxu1 %v5043_v17 }
 0x9ad   :  { %2436 = vmatprep.subr.bf16.mxu1 %v5161_v13 }
 0x9b0   :  { %2437 = vmatpush1.bf16.msra.mxu1 %v5044_v18 }
 0x9b1   :  { %2438 = vmatprep.subr.bf16.mxu1 %v5161_v13 }
 0x9b4   :  { %2439 = vmatpush1.bf16.msra.mxu1 %v5045_v19 }
 0x9b5   :  { %2440 = vmatprep.subr.bf16.mxu1 %v5161_v13 }
 0x9b8   :  { %2441 = vmatpush1.bf16.msra.mxu1 %v5046_v20 }
 0x9b9   :  { %2442 = vmatprep.subr.bf16.mxu1 %v5161_v13 }
 0x9bc   :  { %2443 = vmatpush1.bf16.msra.mxu1 %v5047_v21 }
 0x9bd   :  { %2444 = vmatprep.subr.bf16.mxu1 %v5161_v13 }
 0x9c0   :  { %2445 = vmatpush1.bf16.msra.mxu1 %v5048_v22  ;;  %v2667_v22 = vld [vmem:[#allocation2 + $0x370] sm:$0xff] }
 0x9c1   :  { %2446 = vmatprep.subr.bf16.mxu1 %v5161_v13 }
 0x9c4   :  { %2447 = vmatpush1.bf16.msra.mxu1 %v5049_v23  ;;  %v2869_v23 = vld [vmem:[#allocation2 + $0x3f0] sm:$0xff] }
 0x9c5   :  { %2448 = vmatprep.subr.bf16.mxu1 %v5161_v13 }
 0x9c8   :  { %2449 = vmatpush1.bf16.msra.mxu1 %v5050_v24 }
 0x9c9   :  { %2450 = vmatprep.subr.bf16.mxu1 %v5161_v13 }
 0x9cc   :  { %2451 = vmatpush1.bf16.msra.mxu1 %v5051_v25 }
 0x9cd   :  { %2452 = vmatprep.subr.bf16.mxu1 %v5161_v13 }
 0x9d0   :  { %2453 = vmatpush1.bf16.msra.mxu1 %v5052_v26 }
 0xa76   :  { %v4223_v32 = vpop.f32.mrb[12].mxu1 }
 0xa77   :  { %v4224_v33 = vpop.f32.mrb[13].mxu1 }
 0xa78   :  { %v4225_v35 = vadd.f32 %v4224_v33, %v4223_v32  ;;  %v4226_v36 = vpop.f32.mrb[14].mxu1 }
 0xa79   :  { %v4227_v37 = vpop.f32.mrb[15].mxu1 }
 0xa7a   :  { %v1672_v38 = vadd.f32 %v4225_v35, %v1671_v34 }
 0xa7c   :  { %1674 = vst.msk [vmem:[%s5510_s4] sm:$0x3] %vm1673_vm7, %v1672_v38  ;;  %v1676_v39 = vmul.f32 0.5, %v1672_v38 }
 0xa7e   :  { %v1677_v40 = vmul.f32 1.442695, %v1676_v39 }
 0xa80   :  { %5093 = vpow2.f32 %v1677_v40 }
 0xa8a   :  { %v5094_v46 = vpop.eup %5093 }
 0xa8b   :  { %1680 = vrot.lane.b32.xlu0 %v5094_v46, %s5168_s6  ;;  %v2474_v46 = vld [vmem:[#allocation2 + $0x300] sm:$0xff] }
 0xafd   :  { %v1681_v48 = vpop.permute.xlu0 %1680 }
 0xafe   :  { %v1683_v49 = vmul.f32 %v1681_v48, %v1675_v47  ;;  %v4848_v47 = vpack.c.bf16 %v2474_v46, %v2473_v44  ;;  %v2475_v48 = vld [vmem:[#allocation2 + $0x310] sm:$0xff]  ;;  %v2670_v46 = vld [vmem:[#allocation2 + $0x3a0] sm:$0xff] }
 0xaff   :  { %v2871_v44 = vld [vmem:[#allocation2 + $0x410] sm:$0xff] }
 0xb00   :  { %v1684_v50 = vadd.f32 %v1683_v49, %v1672_v38  ;;  %v2476_v49 = vld [vmem:[#allocation2 + $0x320] sm:$0xff] }
 0xb02   :  { %v1686_v51 = vpack.c.bf16 %v1684_v50, %v1684_v50  ;;  %v4851_v50 = vpack.c.bf16 %v2476_v49, %v2475_v48  ;;  %v2768_v48 = vld [vmem:[#allocation2 + $0x3b0] sm:$0xff]  ;;  %v2769_v49 = vld [vmem:[#allocation2 + $0x3c0] sm:$0xff] }
 0xb04   :  { %4044 = vmatmul.mubr.msk.bf16.vlgmr.msra.gmra.mrb[24].mxu0 %vm1195_vm6, %v1686_v51  ;;  %v2477_v51 = vld [vmem:[#allocation2 + $0x330] sm:$0xff] }
 0xb05   :  { %4530 = vmatprep.mubr.msk.f32.mxu0 %vm5165_vm4, %v5166_v55  ;;  %v4854_v53 = vpack.c.bf16 %v2478_v52, %v2477_v51  ;;  %v2771_v51 = vld [vmem:[#allocation2 + $0x3e0] sm:$0xff] }
 0xb06   :  { %v5053_v52 = vld [vmem:[#allocation4 + $0x320] ss:$8 sps:$4 sm:$0xff]  }
 0xbd7   :  { %v1749_v57 = vpop.f32.mrb[24].mxu0 }
 0xbd8   :  { %v1750_v58 = vadd.f32 %v1749_v57, %v1693_v54  ;;  %v1751_v59 = vpop.f32.mrb[25].mxu0 }
 0xbd9   :  { %v1752_v60 = vadd.f32 %v1751_v59, %v1697_v56  ;;  %v1753_v61 = vpop.f32.mrb[26].mxu0 }
 0xbda   :  { %v1754_v62 = vpop.f32.mrb[27].mxu0  ;;  %1759 = vrot.lane.b32.xlu1 %v1750_v58, %s5167_s28 }
 0xbdb   :  { %1992 = vrot.lane.b32.xlu0 %v1752_v60, %s5167_s28 }
 0xc4c   :  { %v1760_v0 = vpop.permute.xlu1 %1759 }
 0xc4d   :  { %4529 = vmatpush3.msk.msra.mxu0 %vm1765_vm9, %v1760_v0  ;;  %v1993_v2 = vpop.permute.xlu0 %1992 }
 0xc4e   :  { %4531 = vmatmul.mubr.msk.f32.vlgmr.msra.gmra.mrb[28].mxu0 %vm1761_vm10, %v1757_v63  ;;  %4533 = vmatprep.subr.mxu0 %v5166_v55 }
 0xc4f   :  { %4534 = vmatpush3.msk.msra.mxu0 %vm1765_vm9, %v1750_v58  ;;  %4535 = vmatprep.mubr.msk.f32.mxu0 %vm5165_vm4, %v5166_v55 }
 0xc50   :  { %4538 = vmatprep.subr.mxu0 %v5166_v55 }
 0xc56   :  { %4536 = vmatmul.mubr.msk.f32.vlgmr.msra.gmra.mrb[28].mxu0 %vm1761_vm10, %v1756_v6 }
 0xc57   :  { %4539 = vmatpush3.msk.msra.mxu0 %vm1765_vm9, %v1752_v60  ;;  %4540 = vmatprep.mubr.msk.f32.mxu0 %vm5165_vm4, %v5166_v55 }
 0xc58   :  { %4543 = vmatprep.subr.mxu0 %v5166_v55 }
 0xc5e   :  { %4541 = vmatmul.mubr.msk.f32.vlgmr.msra.gmra.mrb[28].mxu0 %vm1761_vm10, %v1913_v1 }
 0xc5f   :  { %4544 = vmatpush3.msk.msra.mxu0 %vm1765_vm9, %v1993_v2  ;;  %4545 = vmatprep.mubr.msk.f32.mxu0 %vm5165_vm4, %v5166_v55 }
 0xc66   :  { %4546 = vmatmul.mubr.msk.f32.vlgmr.msra.gmra.mrb[28].mxu0 %vm1761_vm10, %v1991_v3 }
 0xc67   :  { %4550 = vmatprep.mubr.msk.f32.mxu0 %vm1195_vm6, %v2070_v4 }
 0xd39   :  { %v2065_v5 = vpop.f32.mrb[28].mxu0 }
 0xd3a   :  { %v4547_v9 = vpop.f32.mrb[29].mxu0  ;;  %4548 = vmatprep.subr.mxu0 %v2065_v5 }
 0xd3b   :  { %4549 = vmatpush3.msra.mxu0 %v2065_v5 }
 0xd3c   :  { %4551 = vmatmul.mubr.msk.f32.vlgmr.msra.gmra.mrb[30].mxu0 %vm1195_vm6, %v2071_v8  ;;  %4553 = vmatprep.subr.mxu0 %v2065_v5 }
 0xd3d   :  { %4554 = vmatpush3.msra.mxu0 %v2065_v5  ;;  %4555 = vmatprep.mubr.msk.f32.mxu0 %vm1195_vm6, %v2153_v10 }
 0xd3e   :  { %4558 = vmatprep.subr.mxu0 %v2065_v5 }
 0xd40   :  { %4556 = vmatmul.mubr.msk.f32.vlgmr.msra.gmra.mrb[32].mxu0 %vm1195_vm6, %v2154_v11 }
 0xd41   :  { %4559 = vmatpush3.msra.mxu0 %v2065_v5  ;;  %4560 = vmatprep.mubr.msk.f32.mxu0 %vm1195_vm6, %v2236_v12 }
 0xd42   :  { %4844 = vmatprep.subr.bf16.mxu0 %v5164_v45 }
 0xd44   :  { %4561 = vmatmul.mubr.msk.f32.vlgmr.msra.gmra.mrb[34].mxu0 %vm1195_vm6, %v2237_v14 }
 0xd45   :  { %4579 = vmatprep.mubr.msk.f32.mxu0 %vm5165_vm4, %v5166_v55  ;;  %4846 = vmatpush3.bf16.msra.mxu0 %v4845_v43 }
 0xd46   :  { %4847 = vmatprep.subr.bf16.mxu0 %v5164_v45 }
 0xd49   :  { %4849 = vmatpush3.bf16.msra.mxu0 %v4848_v47 }
 0xd4a   :  { %4850 = vmatprep.subr.bf16.mxu0 %v5164_v45 }
 0xd4d   :  { %4852 = vmatpush3.bf16.msra.mxu0 %v4851_v50 }
 0xd4e   :  { %4853 = vmatprep.subr.bf16.mxu0 %v5164_v45 }
 0xd51   :  { %4855 = vmatpush3.bf16.msra.mxu0 %v4854_v53 }
 0xd52   :  { %4856 = vmatprep.subr.bf16.mxu0 %v5164_v45 }
 0xe0f   :  { %v4552_v27 = vpop.f32.mrb[30].mxu0 }
 0xe10   :  { %v2144_v28 = vpop.f32.mrb[31].mxu0 }
 0xe13   :  { %v4557_v29 = vpop.f32.mrb[32].mxu0 }
 0xe14   :  { %v2227_v30 = vpop.f32.mrb[33].mxu0 }
 0xe15   :  { %v4987_v31 = vpack.i.bf16 %v4557_v29, %v2227_v30 }
 0xe17   :  { %4988 = vrot.lane.b32.xlu1 %v4987_v31, %s5167_s28  ;;  %v4562_v32 = vpop.f32.mrb[34].mxu0  ;;  %v2660_v31 = vld [vmem:[#allocation2 + $0x360] ss:$0 sm:$0xff] }
 0xe18   :  { %v2310_v33 = vpop.f32.mrb[35].mxu0 }
 0xe19   :  { %v2354_v34 = vpack.c.bf16 %v4562_v32, %v2310_v33 }
 0xe1b   :  { %4071 = vmatprep.mubr.msk.bf16.mxu1 %vm451_vm5, %v2354_v34 }
 0xe89   :  { %v4989_v35 = vpop.permute.xlu1 %4988 }
 0xe8a   :  { %v4991_v36 = vunpack.i.h.bf16 %v4989_v35  ;;  %v4990_v37 = vunpack.i.l.bf16 %v4989_v35 }
 0xe8c   :  { %v2328_v38 = vsel %vm451_vm5, %v4552_v27, %v4991_v36  ;;  %v2327_v39 = vsel %vm451_vm5, %v2144_v28, %v4990_v37  ;;  %v2652_v27 = vld [vmem:[#allocation2 + $0x350] ss:$0 sm:$0xff] }
 0xe8d   :  { %v2353_v40 = vpack.c.bf16 %v2328_v38, %v2327_v39 }
 0xe8f   :  { %2463 = vmatmul.mubr.bf16.vlgmr.msra.gmra.mrb[16].mxu1 %v2353_v40 }
 0xe90   :  { %4625 = vmatprep.mubr.msk.f32.mxu1 %vm398_vm3, %v2869_v23 }
 0xf62   :  { %v2464_v54 = vpop.f32.mrb[16].mxu1 }
 0xf63   :  { %v2466_v56 = vpop.f32.mrb[17].mxu1  ;;  %v2479_v58 = vsel %vm451_vm5, %v2464_v54, 0.0 }
 0xf64   :  { %v2467_v57 = vpop.f32.mrb[18].mxu1  ;;  %v5056_v56 = vld [vmem:[#allocation4 + $0x350] ss:$8 sps:$4 sm:$0xff]  }
 0xf65   :  { %v2480_v59 = vsel %vm451_vm5, %v2467_v57, 0.0  ;;  %v2469_v60 = vpop.f32.mrb[19].mxu1 }
 0xf66   :  { %v2481_v61 = vadd.f32 %v2480_v59, %v2479_v58  ;;  %v5058_v58 = vld [vmem:[#allocation4 + $0x370] ss:$8 sps:$4 sm:$0xff]   ;;  %v5059_v59 = vld [vmem:[#allocation4 + $0x380] ss:$8 sps:$4 sm:$0xff]  }
 0xf67   :  { %v5060_v60 = vld [vmem:[#allocation4 + $0x390] ss:$8 sps:$4 sm:$0xff]  }
 0xf68   :  { %v2482_v62 = vrot.slane %v2481_v61, 4 }
 0xf6a   :  { %v2483_v63 = vadd.f32 %v2482_v62, %v2481_v61  ;;  %v5061_v61 = vld [vmem:[#allocation4 + $0x3a0] ss:$8 sps:$4 sm:$0xff]   ;;  %v5062_v62 = vld [vmem:[#allocation4 + $0x3b0] ss:$8 sps:$4 sm:$0xff]  }
 0xf6c   :  { %v2484_v0 = vrot.slane %v2483_v63, 2 }
 0xf6e   :  { %v2485_v6 = vadd.f32 %v2484_v0, %v2483_v63  ;;  %v5063_v63 = vld [vmem:[#allocation4 + $0x3c0] ss:$8 sps:$4 sm:$0xff]  }
 0xf70   :  { %v2486_v1 = vrot.slane %v2485_v6, 1 }
 0xf72   :  { %v2487_v2 = vadd.f32 %v2486_v1, %v2485_v6  ;;  %v5064_v1 = vld [vmem:[#allocation4 + $0x3d0] ss:$8 sps:$4 sm:$0xff]  }
 0xf74   :  { %4580 = vmatmul.mubr.msk.f32.vlgmr.msra.gmra.mrb[36].mxu0 %vm451_vm5, %v2487_v2 }
 0xf75   :  { %4858 = vmatpush3.bf16.msra.mxu0 %v4845_v43  ;;  %4598 = vmatprep.mubr.msk.f32.mxu0 %vm5165_vm4, %v5166_v55  ;;  %v2669_v43 = vld [vmem:[#allocation2 + $0x390] sm:$0xff] }
 0xf76   :  { %4859 = vmatprep.subr.bf16.mxu0 %v5164_v45 }
 0xf79   :  { %4861 = vmatpush3.bf16.msra.mxu0 %v4848_v47  ;;  %v2872_v47 = vld [vmem:[#allocation2 + $0x420] sm:$0xff] }
 0xf7a   :  { %4862 = vmatprep.subr.bf16.mxu0 %v5164_v45 }
 0xf7d   :  { %4864 = vmatpush3.bf16.msra.mxu0 %v4851_v50  ;;  %v2770_v50 = vld [vmem:[#allocation2 + $0x3d0] sm:$0xff] }
 0xf7e   :  { %4865 = vmatprep.subr.bf16.mxu0 %v5164_v45 }
 0xf81   :  { %4867 = vmatpush3.bf16.msra.mxu0 %v4854_v53  ;;  %v5054_v53 = vld [vmem:[#allocation4 + $0x330] ss:$8 sps:$4 sm:$0xff]  }
0x1047   :  { %v2557_v3 = vpop.f32.mrb[36].mxu0 }
0x1048   :  { %v2564_v4 = vrot.slane %v2557_v3, %v5275_v7  ;;  %v4581_v5 = vpop.f32.mrb[37].mxu0 }
0x104a   :  { %v2565_v8 = vsub.f32 %v2464_v54, %v2564_v4  ;;  %v2566_v9 = vsub.f32 %v2467_v57, %v2564_v4  ;;  %v5055_v54 = vld [vmem:[#allocation4 + $0x340] ss:$8 sps:$4 sm:$0xff]  }
0x104b   :  { %v5057_v57 = vld [vmem:[#allocation4 + $0x360] ss:$8 sps:$4 sm:$0xff]  }
0x104c   :  { %v2567_v10 = vmul.f32 %v2565_v8, %v2565_v8  ;;  %v2568_v11 = vmul.f32 %v2566_v9, %v2566_v9 }
0x104e   :  { %v2569_v12 = vsel %vm451_vm5, %v2567_v10, 0.0  ;;  %v2570_v14 = vsel %vm451_vm5, %v2568_v11, 0.0 }
0x104f   :  { %v2571_v15 = vadd.f32 %v2570_v14, %v2569_v12 }
0x1051   :  { %v2572_v16 = vrot.slane %v2571_v15, 4 }
0x1053   :  { %v2573_v17 = vadd.f32 %v2572_v16, %v2571_v15  ;;  %v3145_v16 = vld [vmem:[#allocation2 + $0x430] sm:$0xff] }
0x1055   :  { %v2574_v18 = vrot.slane %v2573_v17, 2 }
0x1057   :  { %v2575_v19 = vadd.f32 %v2574_v18, %v2573_v17  ;;  %v3146_v17 = vld [vmem:[#allocation2 + $0x440] sm:$0xff]  ;;  %v3147_v18 = vld [vmem:[#allocation2 + $0x450] sm:$0xff] }
0x1059   :  { %v2576_v20 = vrot.slane %v2575_v19, 1 }
0x105b   :  { %v2577_v21 = vadd.f32 %v2576_v20, %v2575_v19  ;;  %v5445_v20 = vpack.c.bf16 %v3146_v17, %v3145_v16 }
0x105d   :  { %4599 = vmatmul.mubr.msk.f32.vlgmr.msra.gmra.mrb[38].mxu0 %vm451_vm5, %v2577_v21  ;;  %v3148_v21 = vld [vmem:[#allocation2 + $0x460] sm:$0xff] }
0x105e   :  { %4605 = vmatprep.mubr.msk.f32.mxu0 %vm398_vm3, %v2667_v22  ;;  %v5448_v23 = vpack.c.bf16 %v3148_v21, %v3147_v18 }
0x1130   :  { %v2647_v24 = vpop.f32.mrb[38].mxu0 }
0x1131   :  { %v2648_v25 = vadd.f32 1e-05, %v2647_v24  ;;  %v4600_v26 = vpop.f32.mrb[39].mxu0 }
0x1133   :  { %5095 = vrsqrt.f32 %v2648_v25 }
0x113d   :  { %v5096_v28 = vpop.eup %5095 }
0x113e   :  { %v2653_v29 = vmul.f32 %v5096_v28, %v2652_v27 }
0x1140   :  { %v2657_v30 = vrot.slane %v2653_v29, %v5275_v7 }
0x1142   :  { %v2658_v32 = vmul.f32 %v2657_v30, %v2565_v8  ;;  %v2659_v33 = vmul.f32 %v2657_v30, %v2566_v9 }
0x1144   :  { %v2661_v34 = vadd.f32 %v2660_v31, %v2658_v32  ;;  %v2662_v35 = vadd.f32 %v2660_v31, %v2659_v33 }
0x1146   :  { %v2663_v36 = vmul.f32 0.01, %v2661_v34  ;;  %v2664_v37 = vmul.f32 0.01, %v2662_v35 }
0x1148   :  { %v2665_v38 = vmax.f32 %v2661_v34, %v2663_v36  ;;  %v2666_v39 = vmax.f32 %v2662_v35, %v2664_v37  ;;  %v3149_v36 = vld [vmem:[#allocation2 + $0x470] sm:$0xff]  ;;  %v3150_v37 = vld [vmem:[#allocation2 + $0x480] sm:$0xff] }
0x114a   :  { %v4868_v40 = vpack.c.bf16 %v2666_v39, %v2665_v38  ;;  %v4887_v38 = vpack.c.bf16 %v3150_v37, %v3149_v36  ;;  %v3151_v39 = vld [vmem:[#allocation2 + $0x490] sm:$0xff]  ;;  %v3342_v37 = vld [vmem:[#allocation2 + $0x540] ss:$0 sm:$0xff] }
0x114c   :  { %4869 = vmatprep.subr.bf16.mxu0 %v4868_v40  ;;  %4877 = vmatprep.subr.bf16.mxu1 %v4868_v40 }
0x114d   :  { %4871 = vmatpush3.bf16.msra.mxu0 %v4868_v40  ;;  %4879 = vmatpush3.bf16.msra.mxu1 %v4868_v40 }
0x114e   :  { %4873 = vmatprep.subr.bf16.mxu0 %v4868_v40  ;;  %4880 = vmatprep.subr.bf16.mxu1 %v5164_v45 }
0x1150   :  { %4606 = vmatmul.mubr.msk.f32.vlgmr.msra.gmra.mrb[40].mxu0 %vm398_vm3, %v2668_v41  ;;  %4626 = vmatmul.mubr.msk.f32.vlgmr.msra.gmra.mrb[20].mxu1 %vm398_vm3, %v2870_v42  ;;  %v3153_v42 = vld [vmem:[#allocation2 + $0x4b0] sm:$0xff] }
0x1151   :  { %4875 = vmatpush3.bf16.msra.mxu0 %v4868_v40  ;;  %4608 = vmatprep.mubr.msk.f32.mxu0 %vm398_vm3, %v2669_v43  ;;  %v3152_v40 = vld [vmem:[#allocation2 + $0x4a0] sm:$0xff] }
0x1152   :  { %4628 = vmatprep.mubr.msk.f32.mxu1 %vm398_vm3, %v2871_v44  ;;  %3096 = vmatprep.subr.bf16.mxu0 %v5161_v13  ;;  %v4890_v41 = vpack.c.bf16 %v3152_v40, %v3151_v39  ;;  %v3154_v43 = vld [vmem:[#allocation2 + $0x4c0] sm:$0xff] }
0x1153   :  { %4882 = vmatpush3.bf16.msra.mxu1 %v5445_v20  ;;  %v4893_v44 = vpack.c.bf16 %v3154_v43, %v3153_v42 }
0x1154   :  { %4609 = vmatmul.mubr.msk.f32.gmra.mrb[42].mxu0 %vm398_vm3, %v2670_v46  ;;  %4629 = vmatmul.mubr.msk.f32.gmra.mrb[22].mxu1 %vm398_vm3, %v2872_v47  ;;  %v3155_v46 = vld [vmem:[#allocation2 + $0x4d0] sm:$0xff]  ;;  %v3156_v47 = vld [vmem:[#allocation2 + $0x4e0] sm:$0xff] }
0x1155   :  { %4615 = vmatprep.mubr.msk.f32.mxu0 %vm398_vm3, %v2768_v48  ;;  %4663 = vmatprep.mubr.msk.f32.mxu1 %vm5165_vm4, %v5166_v55  ;;  %v4896_v48 = vpack.c.bf16 %v3156_v47, %v3155_v46 }
0x1156   :  { %4883 = vmatprep.subr.bf16.mxu1 %v5164_v45 }
0x1157   :  { %4885 = vmatpush3.bf16.msra.mxu1 %v5448_v23 }
0x1158   :  { %4616 = vmatmul.mubr.msk.f32.vlgmr.msra.gmra.mrb[44].mxu0 %vm398_vm3, %v2769_v49  ;;  %4886 = vmatprep.subr.bf16.mxu1 %v5164_v45  ;;  %v3157_v49 = vld [vmem:[#allocation2 + $0x4f0] sm:$0xff] }
0x1159   :  { %4618 = vmatprep.mubr.msk.f32.mxu0 %vm398_vm3, %v2770_v50  ;;  %3097 = vmatpush1.bf16.msra.mxu0 %v5053_v52  ;;  %v3158_v50 = vld [vmem:[#allocation2 + $0x500] sm:$0xff]  ;;  %v3159_v52 = vld [vmem:[#allocation2 + $0x510] sm:$0xff] }
0x115a   :  { %3098 = vmatprep.subr.bf16.mxu0 %v5161_v13 }
0x115b   :  { %4888 = vmatpush3.bf16.msra.mxu1 %v4887_v38 }
0x115c   :  { %4619 = vmatmul.mubr.msk.f32.gmra.mrb[46].mxu0 %vm398_vm3, %v2771_v51  ;;  %4889 = vmatprep.subr.bf16.mxu1 %v5164_v45  ;;  %v4899_v51 = vpack.c.bf16 %v3158_v50, %v3157_v49 }
0x115d   :  { %3099 = vmatpush1.bf16.msra.mxu0 %v5054_v53  ;;  %v3160_v53 = vld [vmem:[#allocation2 + $0x520] sm:$0xff] }
0x115e   :  { %3100 = vmatprep.subr.bf16.mxu0 %v5161_v13 }
0x115f   :  { %4891 = vmatpush3.bf16.msra.mxu1 %v4890_v41 }
0x1160   :  { %4892 = vmatprep.subr.bf16.mxu1 %v5164_v45 }
0x1161   :  { %3101 = vmatpush1.bf16.msra.mxu0 %v5055_v54  ;;  %v4902_v54 = vpack.c.bf16 %v3160_v53, %v3159_v52 }
0x1162   :  { %3102 = vmatprep.subr.bf16.mxu0 %v5161_v13 }
0x1163   :  { %4894 = vmatpush3.bf16.msra.mxu1 %v4893_v44 }
0x1164   :  { %4895 = vmatprep.subr.bf16.mxu1 %v5164_v45 }
0x1165   :  { %3103 = vmatpush1.bf16.msra.mxu0 %v5056_v56 }
0x1166   :  { %3104 = vmatprep.subr.bf16.mxu0 %v5161_v13 }
0x1167   :  { %4897 = vmatpush3.bf16.msra.mxu1 %v4896_v48 }
0x1168   :  { %4898 = vmatprep.subr.bf16.mxu1 %v5164_v45 }
0x1169   :  { %3105 = vmatpush1.bf16.msra.mxu0 %v5057_v57 }
0x116a   :  { %3106 = vmatprep.subr.bf16.mxu0 %v5161_v13 }
0x116b   :  { %4900 = vmatpush3.bf16.msra.mxu1 %v4899_v51 }
0x116c   :  { %4901 = vmatprep.subr.bf16.mxu1 %v5164_v45 }
0x116d   :  { %3107 = vmatpush1.bf16.msra.mxu0 %v5058_v58 }
0x116e   :  { %3108 = vmatprep.subr.bf16.mxu0 %v5161_v13 }
0x116f   :  { %4903 = vmatpush3.bf16.msra.mxu1 %v4902_v54 }
0x1170   :  { %4904 = vmatprep.subr.bf16.mxu1 %v5164_v45 }
0x1171   :  { %3109 = vmatpush1.bf16.msra.mxu0 %v5059_v59 }
0x1172   :  { %3110 = vmatprep.subr.bf16.mxu0 %v5161_v13 }
0x1175   :  { %3111 = vmatpush1.bf16.msra.mxu0 %v5060_v60 }
0x1176   :  { %3112 = vmatprep.subr.bf16.mxu0 %v5161_v13 }
0x1179   :  { %3113 = vmatpush1.bf16.msra.mxu0 %v5061_v61 }
0x117a   :  { %3114 = vmatprep.subr.bf16.mxu0 %v5161_v13 }
0x117d   :  { %3115 = vmatpush1.bf16.msra.mxu0 %v5062_v62 }
0x117e   :  { %3116 = vmatprep.subr.bf16.mxu0 %v5161_v13 }
0x1181   :  { %3117 = vmatpush1.bf16.msra.mxu0 %v5063_v63 }
0x1182   :  { %3118 = vmatprep.subr.bf16.mxu0 %v5161_v13 }
0x1185   :  { %3119 = vmatpush1.bf16.msra.mxu0 %v5064_v1 }
0x1223   :  { %v4607_v0 = vpop.f32.mrb[40].mxu0  ;;  %v4627_v6 = vpop.f32.mrb[20].mxu1 }
0x1224   :  { %v2749_v2 = vpop.f32.mrb[41].mxu0  ;;  %v2951_v3 = vpop.f32.mrb[21].mxu1 }
0x1225   :  { %v3015_v4 = vpack.c.bf16 %v4627_v6, %v2951_v3 }
0x1227   :  { %v4610_v5 = vpop.f32.mrb[42].mxu0  ;;  %4098 = vmatprep.mubr.msk.bf16.mxu0 %vm451_vm5, %v3015_v4  ;;  %v4630_v8 = vpop.f32.mrb[22].mxu1 }
0x1228   :  { %v2759_v9 = vpop.f32.mrb[43].mxu0  ;;  %v2961_v10 = vpop.f32.mrb[23].mxu1 }
0x1229   :  { %v3017_v11 = vpack.c.bf16 %v4630_v8, %v2961_v10 }
0x122b   :  { %v4617_v12 = vpop.f32.mrb[44].mxu0 }
0x122c   :  { %v2850_v14 = vpop.f32.mrb[45].mxu0 }
0x122d   :  { %v4992_v15 = vpack.i.bf16 %v4617_v12, %v2850_v14 }
0x122f   :  { %4993 = vrot.lane.b32.xlu0 %v4992_v15, %s5167_s28  ;;  %v4620_v13 = vpop.f32.mrb[46].mxu0 }
0x1230   :  { %v2860_v19 = vpop.f32.mrb[47].mxu0 }
0x1231   :  { %v4997_v22 = vpack.i.bf16 %v4620_v13, %v2860_v19 }
0x1233   :  { %4998 = vrot.lane.b32.xlu1 %v4997_v22, %s5167_s28 }
0x12a1   :  { %v4994_v24 = vpop.permute.xlu0 %4993 }
0x12a2   :  { %v4996_v25 = vunpack.i.h.bf16 %v4994_v24  ;;  %v4995_v26 = vunpack.i.l.bf16 %v4994_v24 }
0x12a4   :  { %v2987_v27 = vsel %vm451_vm5, %v4607_v0, %v4996_v25  ;;  %v2986_v28 = vsel %vm451_vm5, %v2749_v2, %v4995_v26 }
0x12a5   :  { %v3014_v29 = vpack.c.bf16 %v2987_v27, %v2986_v28  ;;  %v4999_v30 = vpop.permute.xlu1 %4998  ;;  %v3355_v28 = vld [vmem:[#allocation2 + $0x550] sm:$0xff] }
0x12a6   :  { %v5001_v31 = vunpack.i.h.bf16 %v4999_v30  ;;  %v5000_v32 = vunpack.i.l.bf16 %v4999_v30 }
0x12a7   :  { %3129 = vmatmul.mubr.bf16.vlgmr.msra.gmra.mrb[48].mxu0 %v3014_v29  ;;  %v3557_v29 = vld [vmem:[#allocation2 + $0x5d0] sm:$0xff] }
0x12a8   :  { %4099 = vmatprep.mubr.msk.bf16.mxu0 %vm451_vm5, %v3017_v11  ;;  %v2988_v33 = vsel %vm451_vm5, %v2759_v9, %v5000_v32  ;;  %v2989_v34 = vsel %vm451_vm5, %v4610_v5, %v5001_v31 }
0x12a9   :  { %v3016_v35 = vpack.c.bf16 %v2989_v34, %v2988_v33  ;;  %v3332_v33 = vld [vmem:[#allocation2 + $0x530] ss:$0 sm:$0xff] }
0x12af   :  { %3137 = vmatmul.mubr.bf16.gmra.mrb[52].mxu0 %v3016_v35 }
0x12b0   :  { %4709 = vmatprep.mubr.msk.f32.mxu0 %vm54_vm0, %v3355_v28 }
0x137a   :  { %v3130_v56 = vpop.f32.mrb[48].mxu0 }
0x137b   :  { %v3132_v57 = vpop.f32.mrb[49].mxu0 }
0x137c   :  { %v3133_v58 = vpop.f32.mrb[50].mxu0  ;;  %v5068_v57 = vld [vmem:[#allocation4 + $0x4e0] ss:$8 sps:$4 sm:$0xff]  }
0x137d   :  { %v3161_v59 = vadd.f32 %v3133_v58, %v3130_v56  ;;  %v3135_v60 = vpop.f32.mrb[51].mxu0 }
0x137e   :  { %v3357_v60 = vld [vmem:[#allocation2 + $0x570] sm:$0xff] }
0x1382   :  { %v3138_v61 = vpop.f32.mrb[52].mxu0 }
0x1383   :  { %v3162_v62 = vadd.f32 %v3161_v59, %v3138_v61  ;;  %v3140_v63 = vpop.f32.mrb[53].mxu0  ;;  %v3558_v59 = vld [vmem:[#allocation2 + $0x5e0] sm:$0xff] }
0x1384   :  { %v3141_v0 = vpop.f32.mrb[54].mxu0  ;;  %v3560_v63 = vld [vmem:[#allocation2 + $0x600] sm:$0xff] }
0x1385   :  { %v3163_v6 = vadd.f32 %v3162_v62, %v3141_v0  ;;  %v3143_v1 = vpop.f32.mrb[55].mxu0  ;;  %v3358_v62 = vld [vmem:[#allocation2 + $0x580] sm:$0xff] }
0x1386   :  { %v5071_v1 = vld [vmem:[#allocation4 + $0x4f0] ss:$8 sps:$4 sm:$0xff]  }
0x1387   :  { %v3164_v2 = vrot.slane %v3163_v6, 4 }
0x1389   :  { %v3165_v3 = vadd.f32 %v3164_v2, %v3163_v6  ;;  %v5065_v6 = vld [vmem:[#allocation4 + $0x460] ss:$8 sps:$4 sm:$0xff]  }
0x138a   :  { %v5074_v2 = vld [vmem:[#allocation4 + $0x500] ss:$8 sps:$4 sm:$0xff]  }
0x138b   :  { %v3166_v4 = vrot.slane %v3165_v3, 2 }
0x138d   :  { %v3167_v5 = vadd.f32 %v3166_v4, %v3165_v3  ;;  %v3457_v3 = vld [vmem:[#allocation2 + $0x5a0] sm:$0xff] }
0x138e   :  { %v5066_v4 = vld [vmem:[#allocation4 + $0x3e0] ss:$8 sps:$4 sm:$0xff]  }
0x138f   :  { %v3168_v8 = vrot.slane %v3167_v5, 1 }
0x1391   :  { %v3169_v9 = vadd.f32 %v3168_v8, %v3167_v5  ;;  %v3458_v5 = vld [vmem:[#allocation2 + $0x5b0] sm:$0xff] }
0x1392   :  { %v5067_v8 = vld [vmem:[#allocation4 + $0x470] ss:$8 sps:$4 sm:$0xff]  }
0x1393   :  { %4664 = vmatmul.mubr.f32.vlgmr.msra.gmra.mrb[24].mxu1 %v3169_v9  ;;  %v5077_v9 = vld [vmem:[#allocation4 + $0x510] ss:$8 sps:$4 sm:$0xff]  }
0x1394   :  { %4906 = vmatpush3.bf16.msra.mxu1 %v5445_v20  ;;  %4698 = vmatprep.mubr.msk.f32.mxu1 %vm5165_vm4, %v5166_v55 }
0x1395   :  { %4907 = vmatprep.subr.bf16.mxu1 %v5164_v45 }
0x1398   :  { %4909 = vmatpush3.bf16.msra.mxu1 %v5448_v23 }
0x1399   :  { %4910 = vmatprep.subr.bf16.mxu1 %v5164_v45 }
0x139c   :  { %4912 = vmatpush3.bf16.msra.mxu1 %v4887_v38 }
0x139d   :  { %4913 = vmatprep.subr.bf16.mxu1 %v5164_v45 }
0x13a0   :  { %4915 = vmatpush3.bf16.msra.mxu1 %v4890_v41 }
0x13a1   :  { %4916 = vmatprep.subr.bf16.mxu1 %v5164_v45 }
0x13a4   :  { %4918 = vmatpush3.bf16.msra.mxu1 %v4893_v44 }
0x13a5   :  { %4919 = vmatprep.subr.bf16.mxu1 %v5164_v45 }
0x13a8   :  { %4921 = vmatpush3.bf16.msra.mxu1 %v4896_v48 }
0x13a9   :  { %4922 = vmatprep.subr.bf16.mxu1 %v5164_v45 }
0x13ac   :  { %4924 = vmatpush3.bf16.msra.mxu1 %v4899_v51 }
0x13ad   :  { %4925 = vmatprep.subr.bf16.mxu1 %v5164_v45 }
0x13b0   :  { %4927 = vmatpush3.bf16.msra.mxu1 %v4902_v54 }
0x1466   :  { %v3236_v55 = vpop.f32.mrb[24].mxu1 }
0x1467   :  { %v3243_v10 = vrot.slane %v3236_v55, %v5275_v7  ;;  %v4665_v11 = vpop.f32.mrb[25].mxu1  ;;  %v3459_v55 = vld [vmem:[#allocation2 + $0x5c0] sm:$0xff] }
0x1468   :  { %v5070_v11 = vld [vmem:[#allocation4 + $0x480] ss:$8 sps:$4 sm:$0xff]  }
0x1469   :  { %v3244_v12 = vsub.f32 %v3130_v56, %v3243_v10  ;;  %v3245_v14 = vsub.f32 %v3133_v58, %v3243_v10  ;;  %v3246_v15 = vsub.f32 %v3138_v61, %v3243_v10  ;;  %v3247_v13 = vsub.f32 %v3141_v0, %v3243_v10  ;;  %v3356_v58 = vld [vmem:[#allocation2 + $0x560] sm:$0xff]  ;;  %v3559_v61 = vld [vmem:[#allocation2 + $0x5f0] sm:$0xff] }
0x146a   :  { %v3456_v0 = vld [vmem:[#allocation2 + $0x590] sm:$0xff] }
0x146b   :  { %v3248_v16 = vmul.f32 %v3244_v12, %v3244_v12  ;;  %v3249_v17 = vmul.f32 %v3245_v14, %v3245_v14  ;;  %v3250_v18 = vmul.f32 %v3246_v15, %v3246_v15  ;;  %v3251_v20 = vmul.f32 %v3247_v13, %v3247_v13  ;;  %v5069_v10 = vld [vmem:[#allocation4 + $0x3f0] ss:$8 sps:$4 sm:$0xff]  }
0x146d   :  { %v3252_v19 = vadd.f32 %v3249_v17, %v3248_v16  ;;  %v5076_v16 = vld [vmem:[#allocation4 + $0x4a0] ss:$8 sps:$4 sm:$0xff]  }
0x146e   :  { %v5078_v17 = vld [vmem:[#allocation4 + $0x420] ss:$8 sps:$4 sm:$0xff]  }
0x146f   :  { %v3253_v21 = vadd.f32 %v3252_v19, %v3250_v18  ;;  %v5079_v18 = vld [vmem:[#allocation4 + $0x4b0] ss:$8 sps:$4 sm:$0xff]  }
0x1470   :  { %v5081_v19 = vld [vmem:[#allocation4 + $0x430] ss:$8 sps:$4 sm:$0xff]  }
0x1471   :  { %v3254_v22 = vadd.f32 %v3253_v21, %v3251_v20  ;;  %v5082_v20 = vld [vmem:[#allocation4 + $0x4c0] ss:$8 sps:$4 sm:$0xff]   ;;  %v5083_v21 = vld [vmem:[#allocation4 + $0x530] ss:$8 sps:$4 sm:$0xff]  }
0x1473   :  { %v3255_v23 = vrot.slane %v3254_v22, 4 }
0x1475   :  { %v3256_v24 = vadd.f32 %v3255_v23, %v3254_v22  ;;  %v5084_v22 = vld [vmem:[#allocation4 + $0x440] ss:$8 sps:$4 sm:$0xff]   ;;  %v5085_v23 = vld [vmem:[#allocation4 + $0x4d0] ss:$8 sps:$4 sm:$0xff]  }
0x1477   :  { %v3257_v25 = vrot.slane %v3256_v24, 2 }
0x1479   :  { %v3258_v45 = vadd.f32 %v3257_v25, %v3256_v24  ;;  %v5086_v24 = vld [vmem:[#allocation4 + $0x540] ss:$8 sps:$4 sm:$0xff]   ;;  %v5087_v25 = vld [vmem:[#allocation4 + $0x450] ss:$8 sps:$4 sm:$0xff]  }
0x147b   :  { %v3259_v26 = vrot.slane %v3258_v45, 1 }
0x147d   :  { %v3260_v27 = vadd.f32 %v3259_v26, %v3258_v45  ;;  %v5088_v45 = vld [vmem:[#allocation4 + $0x550] ss:$8 sps:$4 sm:$0xff]  }
0x147f   :  { %4699 = vmatmul.mubr.f32.vlgmr.msra.gmra.mrb[26].mxu1 %v3260_v27 }
0x1480   :  { %4737 = vmatprep.mubr.msk.f32.mxu1 %vm54_vm0, %v3557_v29 }
0x1552   :  { %v3327_v30 = vpop.f32.mrb[26].mxu1 }
0x1553   :  { %v3328_v31 = vadd.f32 1e-05, %v3327_v30  ;;  %v4700_v32 = vpop.f32.mrb[27].mxu1 }
0x1555   :  { %5097 = vrsqrt.f32 %v3328_v31 }
0x155f   :  { %v5098_v34 = vpop.eup %5097 }
0x1560   :  { %v3333_v35 = vmul.f32 %v5098_v34, %v3332_v33 }
0x1562   :  { %v3337_v36 = vrot.slane %v3333_v35, %v5275_v7 }
0x1564   :  { %v3338_v38 = vmul.f32 %v3337_v36, %v3244_v12  ;;  %v3339_v39 = vmul.f32 %v3337_v36, %v3245_v14  ;;  %v3340_v40 = vmul.f32 %v3337_v36, %v3246_v15  ;;  %v3341_v41 = vmul.f32 %v3337_v36, %v3247_v13  ;;  %v5080_v12 = vld [vmem:[#allocation4 + $0x520] ss:$8 sps:$4 sm:$0xff]   ;;  %v5073_v15 = vld [vmem:[#allocation4 + $0x490] ss:$8 sps:$4 sm:$0xff]  }
0x1565   :  { %v5072_v14 = vld [vmem:[#allocation4 + $0x400] ss:$8 sps:$4 sm:$0xff]   ;;  %v5075_v13 = vld [vmem:[#allocation4 + $0x410] ss:$8 sps:$4 sm:$0xff]  }
0x1566   :  { %v3343_v42 = vadd.f32 %v3342_v37, %v3338_v38  ;;  %v3344_v43 = vadd.f32 %v3342_v37, %v3339_v39  ;;  %v3345_v44 = vadd.f32 %v3342_v37, %v3340_v40  ;;  %v3346_v46 = vadd.f32 %v3342_v37, %v3341_v41 }
0x1568   :  { %v3347_v47 = vmul.f32 0.01, %v3343_v42  ;;  %v3348_v48 = vmul.f32 0.01, %v3344_v43  ;;  %v3349_v49 = vmul.f32 0.01, %v3345_v44 }
0x1569   :  { %v3350_v50 = vmul.f32 0.01, %v3346_v46 }
0x156a   :  { %v3351_v51 = vmax.f32 %v3343_v42, %v3347_v47  ;;  %v3352_v52 = vmax.f32 %v3344_v43, %v3348_v48  ;;  %v3353_v53 = vmax.f32 %v3345_v44, %v3349_v49 }
0x156b   :  { %v3354_v54 = vmax.f32 %v3346_v46, %v3350_v50 }
0x156c   :  { %v4928_v56 = vpack.c.bf16 %v3352_v52, %v3351_v51  ;;  %v3712_v51 = vld [vmem:[#allocation2 + $0x610] ss:$0 sm:$0xff] }
0x156d   :  { %v4932_v7 = vpack.c.bf16 %v3354_v54, %v3353_v53 }
0x156e   :  { %4929 = vmatprep.subr.bf16.mxu0 %v4928_v56  ;;  %4945 = vmatprep.subr.bf16.mxu1 %v4928_v56 }
0x156f   :  { %4931 = vmatpush3.bf16.msra.mxu0 %v4928_v56  ;;  %4947 = vmatpush3.bf16.msra.mxu1 %v4928_v56 }
0x1570   :  { %4933 = vmatprep.subr.bf16.mxu0 %v4932_v7  ;;  %4949 = vmatprep.subr.bf16.mxu1 %v4932_v7 }
0x1573   :  { %4935 = vmatpush3.bf16.msra.mxu0 %v4932_v7  ;;  %4951 = vmatpush3.bf16.msra.mxu1 %v4932_v7 }
0x1574   :  { %4937 = vmatprep.subr.bf16.mxu0 %v4928_v56  ;;  %4743 = vmatprep.subr.bf16.mxu1 %v5068_v57 }
0x1576   :  { %4710 = vmatmul.mubr.msk.f32.vlgmr.msra.gmra.mrb[56].mxu0 %vm54_vm0, %v3356_v58  ;;  %4738 = vmatmul.mubr.msk.f32.vlgmr.msra.gmra.mrb[28].mxu1 %vm54_vm0, %v3558_v59 }
0x1577   :  { %4939 = vmatpush3.bf16.msra.mxu0 %v4928_v56  ;;  %4712 = vmatprep.mubr.msk.f32.mxu0 %vm54_vm0, %v3357_v60 }
0x1578   :  { %4941 = vmatprep.subr.bf16.mxu0 %v4932_v7  ;;  %4740 = vmatprep.mubr.msk.f32.mxu1 %vm54_vm0, %v3559_v61 }
0x1579   :  { %4744 = vmatpush3.bf16.msra.mxu1 %v5068_v57 }
0x157a   :  { %4713 = vmatmul.mubr.msk.f32.gmra.mrb[58].mxu0 %vm54_vm0, %v3358_v62  ;;  %4741 = vmatmul.mubr.msk.f32.gmra.mrb[30].mxu1 %vm54_vm0, %v3560_v63 }
0x157b   :  { %4943 = vmatpush3.bf16.msra.mxu0 %v4932_v7  ;;  %4723 = vmatprep.mubr.msk.f32.mxu0 %vm54_vm0, %v3456_v0 }
0x157c   :  { %4340 = vmatprep.subr.bf16.mxu0 %v5065_v6  ;;  %4745 = vmatprep.subr.bf16.mxu1 %v5071_v1 }
0x157d   :  { %4746 = vmatpush3.bf16.msra.mxu1 %v5071_v1 }
0x157e   :  { %4724 = vmatmul.mubr.msk.f32.vlgmr.msra.gmra.mrb[60].mxu0 %vm54_vm0, %v3457_v3  ;;  %4747 = vmatprep.subr.bf16.mxu1 %v5074_v2 }
0x157f   :  { %4726 = vmatprep.mubr.msk.f32.mxu0 %vm54_vm0, %v3458_v5  ;;  %4341 = vmatpush3.bf16.msra.mxu0 %v5066_v4 }
0x1580   :  { %4342 = vmatprep.subr.bf16.mxu0 %v5067_v8 }
0x1581   :  { %4748 = vmatpush3.bf16.msra.mxu1 %v5074_v2 }
0x1582   :  { %4727 = vmatmul.mubr.msk.f32.gmra.mrb[62].mxu0 %vm54_vm0, %v3459_v55  ;;  %4749 = vmatprep.subr.bf16.mxu1 %v5077_v9 }
0x1583   :  { %4343 = vmatpush3.bf16.msra.mxu0 %v5069_v10 }
0x1584   :  { %4344 = vmatprep.subr.bf16.mxu0 %v5070_v11 }
0x1585   :  { %4750 = vmatpush3.bf16.msra.mxu1 %v5077_v9 }
0x1586   :  { %4751 = vmatprep.subr.bf16.mxu1 %v5080_v12 }
0x1587   :  { %4345 = vmatpush3.bf16.msra.mxu0 %v5072_v14 }
0x1588   :  { %4346 = vmatprep.subr.bf16.mxu0 %v5073_v15 }
0x1589   :  { %4752 = vmatpush3.bf16.msra.mxu1 %v5080_v12 }
0x158a   :  { %4753 = vmatprep.subr.bf16.mxu1 %v5083_v21 }
0x158b   :  { %4347 = vmatpush3.bf16.msra.mxu0 %v5075_v13 }
0x158c   :  { %4348 = vmatprep.subr.bf16.mxu0 %v5076_v16 }
0x158d   :  { %4754 = vmatpush3.bf16.msra.mxu1 %v5083_v21 }
0x158e   :  { %4755 = vmatprep.subr.bf16.mxu1 %v5086_v24 }
0x158f   :  { %4349 = vmatpush3.bf16.msra.mxu0 %v5078_v17 }
0x1590   :  { %4350 = vmatprep.subr.bf16.mxu0 %v5079_v18 }
0x1591   :  { %4756 = vmatpush3.bf16.msra.mxu1 %v5086_v24 }
0x1592   :  { %4757 = vmatprep.subr.bf16.mxu1 %v5088_v45 }
0x1593   :  { %4351 = vmatpush3.bf16.msra.mxu0 %v5081_v19 }
0x1594   :  { %4352 = vmatprep.subr.bf16.mxu0 %v5082_v20 }
0x1595   :  { %4758 = vmatpush3.bf16.msra.mxu1 %v5088_v45 }
0x1597   :  { %4353 = vmatpush3.bf16.msra.mxu0 %v5084_v22 }
0x1598   :  { %4354 = vmatprep.subr.bf16.mxu0 %v5085_v23 }
0x159b   :  { %4355 = vmatpush3.bf16.msra.mxu0 %v5087_v25 }
0x1649   :  { %v4711_v26 = vpop.f32.mrb[56].mxu0  ;;  %v4739_v27 = vpop.f32.mrb[28].mxu1 }
0x164a   :  { %v3437_v28 = vpop.f32.mrb[57].mxu0  ;;  %v3639_v29 = vpop.f32.mrb[29].mxu1 }
0x164b   :  { %v3706_v30 = vpack.c.bf16 %v4711_v26, %v3437_v28  ;;  %v3708_v31 = vpack.c.bf16 %v4739_v27, %v3639_v29 }
0x164d   :  { %v4714_v32 = vpop.f32.mrb[58].mxu0  ;;  %v4742_v33 = vpop.f32.mrb[30].mxu1  ;;  %4759 = vmatprep.mubr.bf16.mxu1 %v3708_v31 }
0x164e   :  { %v3447_v34 = vpop.f32.mrb[59].mxu0  ;;  %v3649_v35 = vpop.f32.mrb[31].mxu1 }
0x164f   :  { %v3709_v36 = vpack.c.bf16 %v4714_v32, %v3447_v34  ;;  %v3711_v37 = vpack.c.bf16 %v4742_v33, %v3649_v35 }
0x1651   :  { %v4725_v38 = vpop.f32.mrb[60].mxu0  ;;  %4760 = vmatmul.mubr.bf16.vlgmr.msra.gmra.mrb[32].mxu1 %v3711_v37 }
0x1652   :  { %v3538_v39 = vpop.f32.mrb[61].mxu0 }
0x1653   :  { %v3707_v40 = vpack.c.bf16 %v4725_v38, %v3538_v39 }
0x1655   :  { %3889 = vmatprep.mubr.bf16.mxu0 %v3707_v40  ;;  %v4728_v41 = vpop.f32.mrb[62].mxu0 }
0x1656   :  { %3890 = vmatmul.mubr.bf16.vlgmr.msra.gmra.mrb[64].mxu0 %v3706_v30  ;;  %v3548_v42 = vpop.f32.mrb[63].mxu0 }
0x1657   :  { %v3710_v43 = vpack.c.bf16 %v4728_v41, %v3548_v42 }
0x1659   :  { %3897 = vmatprep.mubr.bf16.mxu0 %v3710_v43 }
0x165e   :  { %3898 = vmatmul.mubr.bf16.gmra.mrb[68].mxu0 %v3709_v36 }
0x1724   :  { %v4761_v44 = vpop.f32.mrb[32].mxu1 }
0x1725   :  { %v3940_v46 = vpop.f32.mrb[33].mxu1 }
0x1726   :  { %v4762_v47 = vpop.f32.mrb[34].mxu1 }
0x1727   :  { %v3943_v48 = vpop.f32.mrb[35].mxu1 }
0x1729   :  { %v4356_v49 = vpop.f32.mrb[64].mxu0 }
0x172a   :  { %v4357_v50 = vpop.f32.mrb[65].mxu0 }
0x172b   :  { %v4358_v52 = vadd.f32 %v4357_v50, %v4356_v49  ;;  %v4359_v53 = vpop.f32.mrb[66].mxu0 }
0x172c   :  { %v4360_v54 = vpop.f32.mrb[67].mxu0 }
0x172d   :  { %v4361_v56 = vadd.f32 %v4360_v54, %v4359_v53  ;;  %v3892_v7 = vadd.f32 %v4358_v52, %v3712_v51 }
0x172f   :  { %v3941_v57 = vadd.f32 %v3940_v46, %v3892_v7  ;;  %v3895_v58 = vadd.f32 %v4361_v56, %v3712_v51 }
0x1731   :  { %v3955_v59 = vmul.f32 0.5, %v3941_v57  ;;  %v3944_v60 = vadd.f32 %v3943_v48, %v3895_v58  ;;  %v4362_v61 = vpop.f32.mrb[68].mxu0 }
0x1732   :  { %v4363_v62 = vpop.f32.mrb[69].mxu0 }
0x1733   :  { %5099 = vtanh.f32 %v3955_v59  ;;  %v3956_v63 = vmul.f32 0.5, %v3944_v60  ;;  %v4364_v0 = vadd.f32 %v4363_v62, %v4362_v61  ;;  %v4365_v6 = vpop.f32.mrb[70].mxu0 }
0x1734   :  { %v4366_v1 = vpop.f32.mrb[71].mxu0 }
0x1735   :  { %5101 = vtanh.f32 %v3956_v63  ;;  %v3900_v2 = vadd.f32 %v4364_v0, %v3712_v51  ;;  %v4367_v3 = vadd.f32 %v4366_v1, %v4365_v6 }
0x1737   :  { %v3949_v4 = vadd.f32 %v4761_v44, %v3900_v2  ;;  %v3903_v5 = vadd.f32 %v4367_v3, %v3712_v51 }
0x1739   :  { %v3957_v8 = vmul.f32 0.5, %v3949_v4  ;;  %v3952_v9 = vadd.f32 %v4762_v47, %v3903_v5 }
0x173b   :  { %5103 = vtanh.f32 %v3957_v8  ;;  %v3958_v55 = vmul.f32 0.5, %v3952_v9 }
0x173d   :  { %v5100_v10 = vpop.eup %5099  ;;  %5105 = vtanh.f32 %v3958_v55 }
0x173e   :  { %v3963_v11 = vadd.f32 1.0, %v5100_v10 }
0x173f   :  { %v5102_v12 = vpop.eup %5101 }
0x1740   :  { %v3967_v14 = vmul.f32 0.5, %v3963_v11  ;;  %v3964_v15 = vadd.f32 1.0, %v5102_v12 }
0x1742   :  { %3971 = vst.msk [vmem:[%s5511_s5] sm:$0xff] %vm318_vm1, %v3967_v14  ;;  %v3968_v13 = vmul.f32 0.5, %v3964_v15 }
0x1744   :  { %3972 = vst.msk [vmem:[%s5511_s5 + $0x8] sm:$0xff] %vm318_vm1, %v3968_v13 }
0x1745   :  { %v5104_v16 = vpop.eup %5103 }
0x1746   :  { %v3965_v17 = vadd.f32 1.0, %v5104_v16 }
0x1747   :  { %v5106_v18 = vpop.eup %5105 }
0x1748   :  { %v3969_v19 = vmul.f32 0.5, %v3965_v17  ;;  %v3966_v20 = vadd.f32 1.0, %v5106_v18 }
0x174a   :  { %3973 = vst.msk [vmem:[%s5511_s5 + $0x10] sm:$0xff] %vm318_vm1, %v3969_v19  ;;  %v3970_v21 = vmul.f32 0.5, %v3966_v20 }
0x174c   :  { %3974 = vst.msk [vmem:[%s5511_s5 + $0x18] sm:$0xff] %vm318_vm1, %v3970_v21 }
0x174d   :  { %3983 = vsyncpa [#allocation3], 1 }
0x174e   :  { %3984 = vsyncpa [#allocation5], 1 }

</bundles_post_ra>
